<compile_context>
chip_gen: v6e
topology: v6e:2x2x1
jax: 0.10.0
libtpu: 0.0.40
codegen_flags: <defaults>
</compile_context>

<pallas_src>
import functools

import numpy as np

import jax
import jax.numpy as jnp
from jax.experimental import pallas as pl
from jax.experimental.pallas import tpu as pltpu


def _round_up(x, m):
    return ((x + m - 1) // m) * m


def _vmem_capacity_bytes():
    """Physical VMEM of the attached chip; conservative fallback if unqueryable."""
    try:
        return int(pltpu.get_tpu_info().vmem_capacity_bytes)
    except Exception:
        return 64 * 1024 * 1024  # v7x-sized fallback: safe on every generation


def _choose_tile_n(n_points, R, c_pad, out_c, out_itemsize, plane_bytes,
                   w_itemsize, requested):
    """Point-tile size: as big as requested, clamped only by VMEM budget and N.

    Per perf review: no blind ">= 2 grid steps" shrink (pure loss on single-TC
    chips and halves MXU M-fill for small N).  The clamps are (a) the live
    tent/weight/accumulator VMEM footprint vs the queried chip capacity and
    (b) the (rounded-up) point count, so small calls don't pad wastefully.
    """
    RR = R * R
    cap = _vmem_capacity_bytes()
    usable = int(0.60 * cap)               # leave headroom for Mosaic scratch
    per_row = (4 * RR * 4                  # four live f32 tents
               + 2 * RR * w_itemsize       # cast weight operand (+ staging copy)
               + 2 * 3 * 4                 # double-buffered point block
               + 2 * out_c * out_itemsize  # double-buffered output block
               + c_pad * 4)                # f32 accumulator tile
    avail = usable - 2 * plane_bytes       # resident plane slab (worst case 2 bufs)
    budget = avail // per_row if avail > per_row * 8 else 8
    t = min(int(requested), int(budget))
    t = min(t, _round_up(max(int(n_points), 1), 8))   # never tile beyond N
    return max(8, (t // 8) * 8)


def _resident_plane_spec(shape, single_buffer):
    """Constant-index BlockSpec for the plane slab; single-buffer it when large."""
    idx_map = lambda i: (0, 0)
    if single_buffer:
        try:
            # The slab never changes across grid steps; keep one VMEM buffer
            # instead of the default two (big win for large R on v7x's 64 MiB).
            return pl.BlockSpec(shape, idx_map, pipeline_mode=pl.Buffered(1))
        except TypeError:
            pass  # older BlockSpec signature without pipeline_mode
    return pl.BlockSpec(shape, idx_map)


def _triplane_kernel(h_ref, w_ref, coords_ref, planes_ref, out_ref, *,
                     R, c_pad, reduce):
    """One grid step: `tile_n` points against the full resident plane slab.

    h_ref/w_ref : (1, R*R) f32    texel row / col index of flattened texel k
    coords_ref  : (tile_n, 3) f32 points in [-1, 1]
    planes_ref  : (3*R*R, c_pad)  flattened planes, row = p*R*R + h*R + w
    out_ref     : (tile_n, c_pad) for sum/product, (tile_n, 3*c_pad) for concat/none
    """
    RR = R * R
    coords = coords_ref[...]                               # (TN, 3)

    # align_corners=True pixel-space mapping: p = (c + 1) / 2 * (R - 1)
    scale = 0.5 * (R - 1)
    px = (coords[:, 0:1] + 1.0) * scale                    # (TN, 1)
    py = (coords[:, 1:2] + 1.0) * scale
    pz = (coords[:, 2:3] + 1.0) * scale

    h_f = h_ref[...]                                       # (1, RR)
    w_f = w_ref[...]                                       # (1, RR)

    def tent(p, idx):                                      # (TN,1) x (1,RR) -> (TN,RR)
        return jnp.maximum(0.0, 1.0 - jnp.abs(p - idx))

    # 4 distinct separable tents (f32 math on all generations; cast at the dot).
    tx_w = tent(px, w_f)        # planes 0, 1  (x -> grid_x -> width)
    ty_h = tent(py, h_f)        # plane 0      (y -> grid_y -> height)
    ty_w = tent(py, w_f)        # plane 2      (y -> grid_x -> width)
    tz_h = tent(pz, h_f)        # planes 1, 2  (z -> grid_y -> height)

    cd = planes_ref.dtype       # MXU compute dtype == plane storage dtype
    pairs = ((ty_h, tx_w), (tz_h, tx_w), (tz_h, ty_w))     # (height-tent, width-tent)

    acc = None
    for p, (ta, tb) in enumerate(pairs):
        wp = (ta * tb).astype(cd)                          # (TN, RR) bilinear weights
        fp = jnp.dot(wp, planes_ref[p * RR:(p + 1) * RR, :],   # K = R*R per-plane dot
                     preferred_element_type=jnp.float32)       # (TN, c_pad) f32
        if reduce == "sum":
            acc = fp if acc is None else acc + fp
        elif reduce == "product":
            acc = fp if acc is None else acc * fp
        else:  # 'concat' / 'none': lane-aligned 128-wide per-plane column store
            out_ref[:, p * c_pad:(p + 1) * c_pad] = fp.astype(out_ref.dtype)

    if reduce in ("sum", "product"):
        out_ref[...] = acc.astype(out_ref.dtype)


def prepare_planes(plane_coef, dtype=jnp.bfloat16, pad_channels=True):
    """One-time layout prep: NCHW (3, C, R, R) -> (3*R*R, C_pad), row = p*R*R + h*R + w.

    Do this at parameter-setup time (not per forward).  dtype=bfloat16 (default)
    doubles MXU throughput and halves resident-plane VMEM on every generation;
    pass dtype=float32 for bit-tight interpolation.  pad_channels zero-pads C up
    to a multiple of 128 so output stores are unmasked and lane-dense (the extra
    channels are sliced off in the wrapper).
    """
    three, C, R, R2 = plane_coef.shape
    assert three == 3 and R == R2, plane_coef.shape
    planes = jnp.transpose(plane_coef.reshape(3, C, R * R), (0, 2, 1))  # (3, R*R, C)
    c_pad = _round_up(C, 128) if pad_channels else C
    if c_pad != C:
        planes = jnp.pad(planes, ((0, 0), (0, 0), (0, c_pad - C)))
    return planes.reshape(3 * R * R, c_pad).astype(dtype)


def triplane_encoding(in_tensor, planes_flat, resolution, num_components, *,
                      reduce="sum", tile_n=1024, out_dtype=jnp.float32):
    """Pallas implementation of TriplaneEncoding.forward.

    in_tensor   : (..., 3) array in [-1, 1]
    planes_flat : (3*R*R, C_pad) output of prepare_planes()
    out_dtype   : kernel output dtype (bf16 halves writeback traffic if tolerated)
    """
    reduce = reduce.lower()
    assert reduce in ("sum", "product", "concat", "none")
    R, C = int(resolution), int(num_components)
    RR = R * R
    assert planes_flat.shape[0] == 3 * RR, planes_flat.shape
    c_pad = int(planes_flat.shape[1])
    assert c_pad >= C, (c_pad, C)

    orig_shape = in_tensor.shape
    pts = in_tensor.reshape(-1, 3).astype(jnp.float32)
    N = pts.shape[0]

    out_c = c_pad if reduce in ("sum", "product") else 3 * c_pad
    out_itemsize = jnp.dtype(out_dtype).itemsize
    w_itemsize = jnp.dtype(planes_flat.dtype).itemsize
    plane_bytes = planes_flat.size * w_itemsize

    tn = _choose_tile_n(N, R, c_pad, out_c, out_itemsize, plane_bytes,
                        w_itemsize, tile_n)
    n_pad = pl.cdiv(N, tn) * tn
    if n_pad != N:
        pts = jnp.pad(pts, ((0, n_pad - N), (0, 0)))

    # Trace-time texel index rows (review: hoist the per-step iota / div-mod).
    k = np.arange(RR, dtype=np.int64)
    h_idx = (k // R).astype(np.float32).reshape(1, RR)
    w_idx = (k % R).astype(np.float32).reshape(1, RR)

    # Tight VMEM estimate, capped at 75% of the queried physical capacity.
    single_buffer_planes = plane_bytes > (4 << 20)
    plane_bufs = 1 if single_buffer_planes else 2
    est = (plane_bufs * plane_bytes            # resident plane slab
           + 2 * tn * 3 * 4                    # double-buffered point tiles
           + 2 * tn * out_c * out_itemsize     # double-buffered output tiles
           + 2 * 2 * RR * 4                    # texel-index rows
           + 4 * tn * RR * 4                   # live f32 tents
           + 2 * tn * RR * w_itemsize          # cast weight operand(s)
           + tn * c_pad * 4)                   # f32 accumulator
    cap = _vmem_capacity_bytes()
    vmem_limit = int(min(0.75 * cap, max(32 << 20, int(1.3 * est))))

    kernel = functools.partial(_triplane_kernel, R=R, c_pad=c_pad, reduce=reduce)

    out = pl.pallas_call(
        kernel,
        out_shape=jax.ShapeDtypeStruct((n_pad, out_c), out_dtype),
        grid_spec=pltpu.PrefetchScalarGridSpec(
            num_scalar_prefetch=0,
            grid=(n_pad // tn,),
            in_specs=[
                pl.BlockSpec((1, RR), lambda i: (0, 0)),       # texel row indices (const)
                pl.BlockSpec((1, RR), lambda i: (0, 0)),       # texel col indices (const)
                pl.BlockSpec((tn, 3), lambda i: (i, 0)),       # point tile
                _resident_plane_spec((3 * RR, c_pad), single_buffer_planes),
            ],
            out_specs=pl.BlockSpec((tn, out_c), lambda i: (i, 0)),
        ),
        compiler_params=pltpu.CompilerParams(
            dimension_semantics=("parallel",),
            vmem_limit_bytes=vmem_limit,
        ),
    )(h_idx, w_idx, pts, planes_flat)

    if reduce in ("sum", "product"):
        return out[:N, :C].reshape(*orig_shape[:-1], C)
    if reduce == "concat":
        if c_pad == C:
            return out[:N].reshape(*orig_shape[:-1], 3 * C)
        chunks = [out[:N, p * c_pad:p * c_pad + C] for p in range(3)]
        return jnp.concatenate(chunks, axis=-1).reshape(*orig_shape[:-1], 3 * C)
    # 'none': module returns (..., C, 3).  Built directly from the per-plane column
    # slices (single XLA pass, fused with the channel-unpad slice) rather than a
    # separate (N,3,C)->(N,C,3) full-array transpose.
    chunks = [out[:N, p * c_pad:p * c_pad + C] for p in range(3)]
    return jnp.stack(chunks, axis=-1).reshape(*orig_shape[:-1], C, 3)


def triplane_encoding_nchw(in_tensor, plane_coef, *, reduce="sum", tile_n=1024,
                           dtype=jnp.bfloat16, pad_channels=True,
                           out_dtype=jnp.float32):
    """Convenience path accepting the raw NCHW parameter (layout prep per call)."""
    R, C = plane_coef.shape[-1], plane_coef.shape[1]
    planes_flat = prepare_planes(plane_coef, dtype=dtype, pad_channels=pad_channels)
    return triplane_encoding(in_tensor, planes_flat, R, C, reduce=reduce,
                             tile_n=tile_n, out_dtype=out_dtype)


# ----------------------------------------------------------------------------
# Pure-JAX reference (gather-based bilinear grid_sample, align_corners=True)
# used only to verify the kernel.
# ----------------------------------------------------------------------------
def _ref_triplane(pts, plane_coef, reduce="sum"):
    R = plane_coef.shape[-1]

    def sample(plane, gx, gy):  # plane: (C, R, R); gx -> width, gy -> height
        px = (gx + 1.0) * 0.5 * (R - 1)
        py = (gy + 1.0) * 0.5 * (R - 1)
        x0 = jnp.clip(jnp.floor(px).astype(jnp.int32), 0, R - 1)
        y0 = jnp.clip(jnp.floor(py).astype(jnp.int32), 0, R - 1)
        x1 = jnp.clip(x0 + 1, 0, R - 1)
        y1 = jnp.clip(y0 + 1, 0, R - 1)
        fx = px - x0
        fy = py - y0
        v00 = plane[:, y0, x0]
        v01 = plane[:, y0, x1]
        v10 = plane[:, y1, x0]
        v11 = plane[:, y1, x1]
        return (v00 * (1 - fy) * (1 - fx) + v01 * (1 - fy) * fx +
                v10 * fy * (1 - fx) + v11 * fy * fx)              # (C, N)

    f0 = sample(plane_coef[0], pts[:, 0], pts[:, 1])
    f1 = sample(plane_coef[1], pts[:, 0], pts[:, 2])
    f2 = sample(plane_coef[2], pts[:, 1], pts[:, 2])
    if reduce == "sum":
        return (f0 + f1 + f2).T
    if reduce == "product":
        return (f0 * f1 * f2).T
    if reduce == "concat":
        return jnp.concatenate([f0, f1, f2], axis=0).T            # (N, 3C)
    return jnp.stack([f0.T, f1.T, f2.T], axis=-1)                 # 'none': (N, C, 3)


if __name__ == "__main__":
    key = jax.random.PRNGKey(0)
    k_plane, k_pts = jax.random.split(key)

    resolution = 16
    num_components = 64
    init_scale = 0.1

    # nn.Parameter(init_scale * randn(3, C, R, R)) -- deterministic synthetic init.
    plane_coef = init_scale * jax.random.normal(
        k_plane, (3, num_components, resolution, resolution), dtype=jnp.float32)

    # Points in [-1, 1]; batched shape (..., 3) as the module expects.
    x = jax.random.uniform(k_pts, (2, 64, 3), minval=-1.0, maxval=1.0,
                           dtype=jnp.float32)
    pts_flat = x.reshape(-1, 3)

    # One-time parameter layout prep: bf16 fast path (default) and f32 exact path.
    planes_bf16 = prepare_planes(plane_coef)                      # bf16, C padded to 128
    planes_f32 = prepare_planes(plane_coef, dtype=jnp.float32)    # f32, C padded to 128

    # reduce='sum' (module default) -------------------------------------------
    out_sum_f32 = jax.block_until_ready(
        triplane_encoding(x, planes_f32, resolution, num_components, reduce="sum"))
    out_sum_bf16 = jax.block_until_ready(
        triplane_encoding(x, planes_bf16, resolution, num_components, reduce="sum"))
    ref_sum = _ref_triplane(pts_flat, plane_coef, "sum").reshape(2, 64, num_components)
    assert out_sum_f32.shape == (2, 64, num_components), out_sum_f32.shape
    assert jnp.allclose(out_sum_f32, ref_sum, atol=2e-4, rtol=2e-4), \
        float(jnp.max(jnp.abs(out_sum_f32 - ref_sum)))
    assert jnp.allclose(out_sum_bf16, ref_sum, atol=2e-2, rtol=2e-2), \
        float(jnp.max(jnp.abs(out_sum_bf16 - ref_sum)))

    # reduce='product' ---------------------------------------------------------
    out_prod = jax.block_until_ready(
        triplane_encoding(x, planes_f32, resolution, num_components, reduce="product"))
    ref_prod = _ref_triplane(pts_flat, plane_coef, "product").reshape(2, 64, num_components)
    assert jnp.allclose(out_prod, ref_prod, atol=2e-4, rtol=2e-4), \
        float(jnp.max(jnp.abs(out_prod - ref_prod)))

    # reduce='concat' ----------------------------------------------------------
    out_cat = jax.block_until_ready(
        triplane_encoding(x, planes_f32, resolution, num_components, reduce="concat"))
    ref_cat = _ref_triplane(pts_flat, plane_coef, "concat").reshape(
        2, 64, 3 * num_components)
    assert out_cat.shape == (2, 64, 3 * num_components), out_cat.shape
    assert jnp.allclose(out_cat, ref_cat, atol=2e-4, rtol=2e-4), \
        float(jnp.max(jnp.abs(out_cat - ref_cat)))

    # reduce='none' ------------------------------------------------------------
    out_none = jax.block_until_ready(
        triplane_encoding(x, planes_f32, resolution, num_components, reduce="none"))
    ref_none = _ref_triplane(pts_flat, plane_coef, "none").reshape(
        2, 64, num_components, 3)
    assert out_none.shape == (2, 64, num_components, 3), out_none.shape
    assert jnp.allclose(out_none, ref_none, atol=2e-4, rtol=2e-4), \
        float(jnp.max(jnp.abs(out_none - ref_none)))

    print("KERNEL_OK")
</pallas_src>

<mosaic_0001>
module attributes {stable_mosaic.version = 11 : i64} {
  func.func @_triplane_kernel(%arg0: i32, %arg1: memref<1x256xf32, #tpu.memory_space<vmem>>, %arg2: memref<1x256xf32, #tpu.memory_space<vmem>>, %arg3: memref<128x3xf32, #tpu.memory_space<vmem>>, %arg4: memref<768x128xf32, #tpu.memory_space<vmem>>, %arg5: memref<128x128xf32, #tpu.memory_space<vmem>>) attributes {dimension_semantics = [#tpu.dimension_semantics<parallel>], iteration_bounds = array<i64: 1>, scalar_prefetch = 0 : i64, scratch_operands = 0 : i64, tpu.core_type = #tpu.core_type<tc>, window_params = [{pipeline_mode = #tpu.pipeline_mode<synchronous>, transform_indices = @transform_0, window_bounds = array<i64: 1, 256>}, {pipeline_mode = #tpu.pipeline_mode<synchronous>, transform_indices = @transform_1, window_bounds = array<i64: 1, 256>}, {transform_indices = @transform_2, window_bounds = array<i64: 128, 3>}, {pipeline_mode = #tpu.pipeline_mode<synchronous>, transform_indices = @transform_3, window_bounds = array<i64: 768, 128>}, {transform_indices = @transform_4, window_bounds = array<i64: 128, 128>}]} {
    %c0 = arith.constant 0 : index
    %c0_0 = arith.constant 0 : index
    %0 = vector.load %arg3[%c0, %c0_0] : memref<128x3xf32, #tpu.memory_space<vmem>>, vector<128x3xf32>
    %1 = vector.extract_strided_slice %0 {offsets = [0, 0], sizes = [128, 1], strides = [1, 1]} : vector<128x3xf32> to vector<128x1xf32>
    %cst = arith.constant 1.000000e+00 : f32
    %2 = vector.broadcast %cst : f32 to vector<128x1xf32>
    %3 = arith.addf %1, %2 : vector<128x1xf32>
    %cst_1 = arith.constant 7.500000e+00 : f32
    %4 = vector.broadcast %cst_1 : f32 to vector<128x1xf32>
    %5 = arith.mulf %3, %4 : vector<128x1xf32>
    %6 = vector.extract_strided_slice %0 {offsets = [0, 1], sizes = [128, 1], strides = [1, 1]} : vector<128x3xf32> to vector<128x1xf32>
    %cst_2 = arith.constant 1.000000e+00 : f32
    %7 = vector.broadcast %cst_2 : f32 to vector<128x1xf32>
    %8 = arith.addf %6, %7 : vector<128x1xf32>
    %cst_3 = arith.constant 7.500000e+00 : f32
    %9 = vector.broadcast %cst_3 : f32 to vector<128x1xf32>
    %10 = arith.mulf %8, %9 : vector<128x1xf32>
    %11 = vector.extract_strided_slice %0 {offsets = [0, 2], sizes = [128, 1], strides = [1, 1]} : vector<128x3xf32> to vector<128x1xf32>
    %cst_4 = arith.constant 1.000000e+00 : f32
    %12 = vector.broadcast %cst_4 : f32 to vector<128x1xf32>
    %13 = arith.addf %11, %12 : vector<128x1xf32>
    %cst_5 = arith.constant 7.500000e+00 : f32
    %14 = vector.broadcast %cst_5 : f32 to vector<128x1xf32>
    %15 = arith.mulf %13, %14 : vector<128x1xf32>
    %c0_6 = arith.constant 0 : index
    %c0_7 = arith.constant 0 : index
    %16 = vector.load %arg1[%c0_6, %c0_7] : memref<1x256xf32, #tpu.memory_space<vmem>>, vector<1x256xf32>
    %c0_8 = arith.constant 0 : index
    %c0_9 = arith.constant 0 : index
    %17 = vector.load %arg2[%c0_8, %c0_9] : memref<1x256xf32, #tpu.memory_space<vmem>>, vector<1x256xf32>
    %18 = vector.broadcast %5 : vector<128x1xf32> to vector<128x256xf32>
    %19 = vector.broadcast %17 : vector<1x256xf32> to vector<128x256xf32>
    %20 = arith.subf %18, %19 : vector<128x256xf32>
    %21 = math.absf %20 : vector<128x256xf32>
    %cst_10 = arith.constant 1.000000e+00 : f32
    %22 = vector.broadcast %cst_10 : f32 to vector<128x256xf32>
    %23 = arith.subf %22, %21 : vector<128x256xf32>
    %cst_11 = arith.constant 0.000000e+00 : f32
    %24 = vector.broadcast %cst_11 : f32 to vector<128x256xf32>
    %25 = arith.maximumf %24, %23 : vector<128x256xf32>
    %26 = vector.broadcast %10 : vector<128x1xf32> to vector<128x256xf32>
    %27 = vector.broadcast %16 : vector<1x256xf32> to vector<128x256xf32>
    %28 = arith.subf %26, %27 : vector<128x256xf32>
    %29 = math.absf %28 : vector<128x256xf32>
    %cst_12 = arith.constant 1.000000e+00 : f32
    %30 = vector.broadcast %cst_12 : f32 to vector<128x256xf32>
    %31 = arith.subf %30, %29 : vector<128x256xf32>
    %cst_13 = arith.constant 0.000000e+00 : f32
    %32 = vector.broadcast %cst_13 : f32 to vector<128x256xf32>
    %33 = arith.maximumf %32, %31 : vector<128x256xf32>
    %34 = vector.broadcast %10 : vector<128x1xf32> to vector<128x256xf32>
    %35 = vector.broadcast %17 : vector<1x256xf32> to vector<128x256xf32>
    %36 = arith.subf %34, %35 : vector<128x256xf32>
    %37 = math.absf %36 : vector<128x256xf32>
    %cst_14 = arith.constant 1.000000e+00 : f32
    %38 = vector.broadcast %cst_14 : f32 to vector<128x256xf32>
    %39 = arith.subf %38, %37 : vector<128x256xf32>
    %cst_15 = arith.constant 0.000000e+00 : f32
    %40 = vector.broadcast %cst_15 : f32 to vector<128x256xf32>
    %41 = arith.maximumf %40, %39 : vector<128x256xf32>
    %42 = vector.broadcast %15 : vector<128x1xf32> to vector<128x256xf32>
    %43 = vector.broadcast %16 : vector<1x256xf32> to vector<128x256xf32>
    %44 = arith.subf %42, %43 : vector<128x256xf32>
    %45 = math.absf %44 : vector<128x256xf32>
    %cst_16 = arith.constant 1.000000e+00 : f32
    %46 = vector.broadcast %cst_16 : f32 to vector<128x256xf32>
    %47 = arith.subf %46, %45 : vector<128x256xf32>
    %cst_17 = arith.constant 0.000000e+00 : f32
    %48 = vector.broadcast %cst_17 : f32 to vector<128x256xf32>
    %49 = arith.maximumf %48, %47 : vector<128x256xf32>
    %50 = arith.mulf %33, %25 : vector<128x256xf32>
    %c0_18 = arith.constant 0 : index
    %c0_19 = arith.constant 0 : index
    %51 = vector.load %arg4[%c0_18, %c0_19] : memref<768x128xf32, #tpu.memory_space<vmem>>, vector<256x128xf32>
    %cst_20 = arith.constant dense<0.000000e+00> : vector<128x128xf32>
    %52 = tpu.matmul %50, %51, %cst_20 {dimension_numbers = #tpu.dot_dimension_numbers<[1], [0], [0], [1], [0, 0, 1, 1], [], []>} : vector<128x256xf32>, vector<256x128xf32>, vector<128x128xf32> -> vector<128x128xf32>
    %53 = arith.mulf %49, %25 : vector<128x256xf32>
    %c256 = arith.constant 256 : index
    %c0_21 = arith.constant 0 : index
    %54 = vector.load %arg4[%c256, %c0_21] : memref<768x128xf32, #tpu.memory_space<vmem>>, vector<256x128xf32>
    %cst_22 = arith.constant dense<0.000000e+00> : vector<128x128xf32>
    %55 = tpu.matmul %53, %54, %cst_22 {dimension_numbers = #tpu.dot_dimension_numbers<[1], [0], [0], [1], [0, 0, 1, 1], [], []>} : vector<128x256xf32>, vector<256x128xf32>, vector<128x128xf32> -> vector<128x128xf32>
    %56 = arith.addf %52, %55 : vector<128x128xf32>
    %57 = arith.mulf %49, %41 : vector<128x256xf32>
    %c512 = arith.constant 512 : index
    %c0_23 = arith.constant 0 : index
    %58 = vector.load %arg4[%c512, %c0_23] : memref<768x128xf32, #tpu.memory_space<vmem>>, vector<256x128xf32>
    %cst_24 = arith.constant dense<0.000000e+00> : vector<128x128xf32>
    %59 = tpu.matmul %57, %58, %cst_24 {dimension_numbers = #tpu.dot_dimension_numbers<[1], [0], [0], [1], [0, 0, 1, 1], [], []>} : vector<128x256xf32>, vector<256x128xf32>, vector<128x128xf32> -> vector<128x128xf32>
    %60 = arith.addf %56, %59 : vector<128x128xf32>
    %c0_25 = arith.constant 0 : index
    %c0_26 = arith.constant 0 : index
    %61 = vector.load %arg5[%c0_25, %c0_26] : memref<128x128xf32, #tpu.memory_space<vmem>>, vector<128x128xf32>
    tpu.vector_store %arg5[%c0_25, %c0_26], %60 {strides = array<i32>} : memref<128x128xf32, #tpu.memory_space<vmem>>, vector<128x128xf32>,
    return
  }
  func.func @transform_0(%arg0: i32) -> (i32, i32) {
    %c0_i32 = arith.constant 0 : i32
    %c0_i32_0 = arith.constant 0 : i32
    %c0_i32_1 = arith.constant 0 : i32
    return %c0_i32, %c0_i32_0 : i32, i32
  }
  func.func @transform_1(%arg0: i32) -> (i32, i32) {
    %c0_i32 = arith.constant 0 : i32
    %c0_i32_0 = arith.constant 0 : i32
    %c0_i32_1 = arith.constant 0 : i32
    return %c0_i32, %c0_i32_0 : i32, i32
  }
  func.func @transform_2(%arg0: i32) -> (i32, i32) {
    %c0_i32 = arith.constant 0 : i32
    %c0_i32_0 = arith.constant 0 : i32
    return %arg0, %c0_i32 : i32, i32
  }
  func.func @transform_3(%arg0: i32) -> (i32, i32) {
    %c0_i32 = arith.constant 0 : i32
    %c0_i32_0 = arith.constant 0 : i32
    %c0_i32_1 = arith.constant 0 : i32
    return %c0_i32, %c0_i32_0 : i32, i32
  }
  func.func @transform_4(%arg0: i32) -> (i32, i32) {
    %c0_i32 = arith.constant 0 : i32
    %c0_i32_0 = arith.constant 0 : i32
    return %arg0, %c0_i32 : i32, i32
  }
}

</mosaic_0001>

<bundles_post_ra>
// kernel: tpu_custom_call.1
= control target key start
LH: loop header
LB: loop body
LE: loop exit
PB: predicated region body
PF: predicated region fallthrough
CT: control target
= control target key end

     0   :  { %9 = vsyncpa [#allocation3], 0  ;;  %s2602_s0 = inlined_call_operand.vmem [shape: f32[1,256], index: 0, kind: input, shape index: {}]   ;;  %s2603_s1 = inlined_call_operand.vmem [shape: f32[1,256], index: 1, kind: input, shape index: {}]   ;;  %s2604_s2 = inlined_call_operand.vmem [shape: f32[128,3], index: 2, kind: input, shape index: {}]   ;;  %s2605_s3 = inlined_call_operand.hbm [shape: f32[768,128], index: 3, kind: input, shape index: {}]   ;;  %s2606_s4 = inlined_call_operand.hbm [shape: f32[128,128], index: 4, kind: output, shape index: {}]  }
   0x1   :  { %10 = vsyncpa [#allocation4], 0  ;;  %s1831_s15 = smov [#allocation2]  }
   0x2   :  { %s22_s16 = sshll.u32 %s1831_s15, 4  ;;  %s23_s16 = int_to_ptr.vmem [resolvable:$true] %s22_s16 }
   0x3   :  { %s1795_s17 = scalar_lea.vmem %s23_s16, 12288  ;;  %p1800_p1 = scmp.lt.s32.totalorder %s23_s16, %s23_s16 }
   0x4   :  { %p1796_p0 = scmp.ne.s32.totalorder %s23_s16, %s1795_s17  ;;  %p1801_p2 = scmp.lt.s32.totalorder %s1795_s17, %s1795_s17 }
   0x6   :  { %p1802_p3 = por %p1801_p2, %p1800_p1 }
   0x8   :  { %p1803_p4 = pnand %p1802_p3, %p1796_p0 }
   0xa   :  { %1806 = shalt.err (!%p1803_p4)
}
   0xb   :  { %s1832_s18 = smov 128   ;;  %s1833_s19 = smov 8  }
   0xc   :  { %28 = dma.hbm_to_vmem [thread:$0]  %s2605_s3, 12288, %s23_s16, [#allocation3], %s1832_s18, %s1832_s18, %s1833_s19  }
   0xd   :  { %1827 = dma.done.wait [#allocation3], 12288  }
   0xe   :  { %1828 = vsyncadd [#allocation3], 4294955008  ;;  %v1834_v0 = vmov 0   ;;  %v40_v1 = vld [vmem:[%s2604_s2 + $0x40] sm:$0xff]  ;;  %v41_v7 = vld [vmem:[%s2604_s2 + $0x48] sm:$0xff]  ;;  %v1835_v13 = vmov 2  }
   0xf   :  { %1781 = vset.pattern.permute.xlu1 %v1834_v0  ;;  %1779 = vset.pattern.permute.xlu0 %v1834_v0  ;;  %v32_v2 = vld [vmem:[%s2604_s2] sm:$0xff]  ;;  %v56_v3 = vadd.f32 1.0, %v40_v1  ;;  %v57_v8 = vadd.f32 1.0, %v41_v7  ;;  %v951_v9 = vld [vmem:[#allocation2 + $0x1f8] sm:$0xff]  ;;  %v33_v10 = vld [vmem:[%s2604_s2 + $0x8] sm:$0xff] }
  0x10   :  { %v48_v4 = vadd.f32 1.0, %v32_v2  ;;  %1500 = vmatprep.subr.mxu0 %v951_v9  ;;  %1740 = vmatprep.subr.mxu1 %v951_v9  ;;  %v935_v11 = vld [vmem:[#allocation2 + $0x178] sm:$0xff]  ;;  %v950_v12 = vld [vmem:[#allocation2 + $0x1f0] sm:$0xff]  ;;  %v49_v16 = vadd.f32 1.0, %v33_v10  ;;  %v949_v17 = vld [vmem:[#allocation2 + $0x1e8] sm:$0xff] }
  0x11   :  { %v1875_v5 = vmul.f32 7.5, %v56_v3  ;;  %1501 = vmatpush3.msra.mxu0 %v935_v11  ;;  %1756 = vmatpush3.msra.mxu1 %v935_v11  ;;  %v934_v14 = vld [vmem:[#allocation2 + $0x170] sm:$0xff]  ;;  %v1891_v15 = vmul.f32 7.5, %v57_v8  ;;  %v933_v19 = vld [vmem:[#allocation2 + $0x168] sm:$0xff]  ;;  %v948_v20 = vld [vmem:[#allocation2 + $0x1e0] sm:$0xff] }
  0x12   :  { %v1877_v6 = vmul.f32 7.5, %v48_v4  ;;  %v42_v18 = vld [vmem:[%s2604_s2 + $0x50] sm:$0xff]  ;;  %1502 = vmatprep.subr.mxu0 %v950_v12  ;;  %1741 = vmatprep.subr.mxu1 %v950_v12  ;;  %v1897_v21 = vmul.f32 7.5, %v49_v16  ;;  %v932_v23 = vld [vmem:[#allocation2 + $0x160] sm:$0xff]  ;;  %v947_v25 = vld [vmem:[#allocation2 + $0x1d8] sm:$0xff] }
  0x13   :  { %124 = vperm.xlu0 %1779, %v1875_v5   ;;  %1503 = vmatpush3.msra.mxu0 %v934_v14  ;;  %v58_v22 = vadd.f32 1.0, %v42_v18  ;;  %v34_v24 = vld [vmem:[%s2604_s2 + $0x10] sm:$0xff]  ;;  %v931_v26 = vld [vmem:[#allocation2 + $0x158] sm:$0xff]  ;;  %v945_v32 = vld [vmem:[#allocation2 + $0x1c8] sm:$0xff] }
  0x14   :  { %84 = vperm.xlu1 %1781, %v1877_v6   ;;  %1757 = vmatpush3.msra.mxu1 %v934_v14  ;;  %v50_v28 = vadd.f32 1.0, %v34_v24  ;;  %v946_v29 = vld [vmem:[#allocation2 + $0x1d0] sm:$0xff]  ;;  %v43_v30 = vld [vmem:[%s2604_s2 + $0x58] sm:$0xff]  ;;  %v929_v35 = vld [vmem:[#allocation2 + $0x148] sm:$0xff] }
  0x15   :  { %1504 = vmatprep.subr.mxu0 %v949_v17  ;;  %1742 = vmatprep.subr.mxu1 %v949_v17  ;;  %v1904_v27 = vmul.f32 7.5, %v58_v22  ;;  %v930_v31 = vld [vmem:[#allocation2 + $0x150] sm:$0xff]  ;;  %v59_v34 = vadd.f32 1.0, %v43_v30  ;;  %v35_v36 = vld [vmem:[%s2604_s2 + $0x18] sm:$0xff]  ;;  %v944_v37 = vld [vmem:[#allocation2 + $0x1c0] sm:$0xff] }
  0x16   :  { %1505 = vmatpush3.msra.mxu0 %v933_v19  ;;  %1758 = vmatpush3.msra.mxu1 %v933_v19  ;;  %v1911_v33 = vmul.f32 7.5, %v50_v28  ;;  %v928_v38 = vld [vmem:[#allocation2 + $0x140] sm:$0xff]  ;;  %v51_v40 = vadd.f32 1.0, %v35_v36  ;;  %v943_v41 = vld [vmem:[#allocation2 + $0x1b8] sm:$0xff]  ;;  %v942_v44 = vld [vmem:[#allocation2 + $0x1b0] sm:$0xff] }
  0x17   :  { %1780 = vset.pattern.permute.xlu0 %v1835_v13  ;;  %1506 = vmatprep.subr.mxu0 %v948_v20  ;;  %v1918_v39 = vmul.f32 7.5, %v59_v34  ;;  %v44_v42 = vld [vmem:[%s2604_s2 + $0x60] sm:$0xff]  ;;  %v927_v43 = vld [vmem:[#allocation2 + $0x138] sm:$0xff]  ;;  %v926_v47 = vld [vmem:[#allocation2 + $0x130] sm:$0xff] }
  0x18   :  { %1782 = vset.pattern.permute.xlu1 %v1835_v13  ;;  %665 = vperm.xlu0 %1780, %v1875_v5   ;;  %v1925_v45 = vmul.f32 7.5, %v51_v40  ;;  %v60_v46 = vadd.f32 1.0, %v44_v42  ;;  %v36_v48 = vld [vmem:[%s2604_s2 + $0x20] sm:$0xff]  ;;  %v941_v49 = vld [vmem:[#allocation2 + $0x1a8] sm:$0xff]  ;;  %v939_v56 = vld [vmem:[#allocation2 + $0x198] sm:$0xff] }
  0x19   :  { %633 = vperm.xlu1 %1782, %v1877_v6   ;;  %1743 = vmatprep.subr.mxu1 %v948_v20  ;;  %v925_v50 = vld [vmem:[#allocation2 + $0x128] sm:$0xff]  ;;  %v52_v52 = vadd.f32 1.0, %v36_v48  ;;  %v940_v53 = vld [vmem:[#allocation2 + $0x1a0] sm:$0xff]  ;;  %v923_v59 = vld [vmem:[#allocation2 + $0x118] sm:$0xff] }
  0x1a   :  { %1507 = vmatpush3.msra.mxu0 %v932_v23  ;;  %1759 = vmatpush3.msra.mxu1 %v932_v23  ;;  %v1932_v51 = vmul.f32 7.5, %v60_v46  ;;  %v45_v54 = vld [vmem:[%s2604_s2 + $0x68] sm:$0xff]  ;;  %v924_v55 = vld [vmem:[#allocation2 + $0x120] sm:$0xff]  ;;  %v938_v61 = vld [vmem:[#allocation2 + $0x190] sm:$0xff] }
  0x1b   :  { %1508 = vmatprep.subr.mxu0 %v947_v25  ;;  %1744 = vmatprep.subr.mxu1 %v947_v25  ;;  %v1939_v57 = vmul.f32 7.5, %v52_v52  ;;  %v61_v58 = vadd.f32 1.0, %v45_v54  ;;  %v37_v60 = vld [vmem:[%s2604_s2 + $0x28] sm:$0xff]  ;;  %v922_v62 = vld [vmem:[#allocation2 + $0x110] sm:$0xff]  ;;  %v936_v4 = vld [vmem:[#allocation2 + $0x180] sm:$0xff]  ;;  %v1836_v25 = vmov 1  }
  0x1c   :  { %669 = vperm.xlu0 %1780, %v1891_v15   ;;  %1509 = vmatpush3.msra.mxu0 %v931_v26  ;;  %v937_v1 = vld [vmem:[#allocation2 + $0x188] sm:$0xff]  ;;  %v46_v2 = vld [vmem:[%s2604_s2 + $0x70] sm:$0xff]  ;;  %v920_v9 = vld [vmem:[#allocation2 + $0x100] sm:$0xff] }
  0x1d   :  { %1783 = vset.pattern.permute.xlu1 %v1834_v0  ;;  %1760 = vmatpush3.msra.mxu1 %v931_v26  ;;  %v1946_v63 = vmul.f32 7.5, %v61_v58  ;;  %v53_v0 = vadd.f32 1.0, %v37_v60  ;;  %v921_v3 = vld [vmem:[#allocation2 + $0x108] sm:$0xff]  ;;  %v62_v8 = vadd.f32 1.0, %v46_v2  ;;  %v38_v10 = vld [vmem:[%s2604_s2 + $0x30] sm:$0xff]  ;;  %v47_v14 = vld [vmem:[%s2604_s2 + $0x78] sm:$0xff] }
  0x1e   :  { %129 = vperm.xlu1 %1783, %v1891_v15   ;;  %1510 = vmatprep.subr.mxu0 %v946_v29  ;;  %v54_v12 = vadd.f32 1.0, %v38_v10  ;;  %v63_v17 = vadd.f32 1.0, %v47_v14  ;;  %v39_v18 = vld [vmem:[%s2604_s2 + $0x38] sm:$0xff] }
  0x1f   :  { %1745 = vmatprep.subr.mxu1 %v946_v29  ;;  %1511 = vmatpush3.msra.mxu0 %v930_v31  ;;  %v69_v7 = vmul.f32 7.5, %v53_v0  ;;  %v78_v11 = vmul.f32 7.5, %v62_v8  ;;  %v887_v19 = vld [vmem:[#allocation2 + $0xf8] sm:$0xff]  ;;  %v55_v23 = vadd.f32 1.0, %v39_v18 }
  0x20   :  { %637 = vperm.xlu0 %1780, %v1897_v21   ;;  %1761 = vmatpush3.msra.mxu1 %v930_v31  ;;  %v70_v16 = vmul.f32 7.5, %v54_v12  ;;  %v1305_v20 = vld [vmem:[#allocation2 + $0x2f8] sm:$0xff]  ;;  %v79_v22 = vmul.f32 7.5, %v63_v17 }
  0x21   :  { %1512 = vmatprep.subr.mxu0 %v945_v32  ;;  %1746 = vmatprep.subr.mxu1 %v945_v32  ;;  %v71_v24 = vmul.f32 7.5, %v55_v23 }
  0x22   :  { %89 = vperm.xlu1 %1783, %v1897_v21   ;;  %1513 = vmatpush3.msra.mxu0 %v929_v35 }
  0x23   :  { %1762 = vmatpush3.msra.mxu1 %v929_v35  ;;  %1514 = vmatprep.subr.mxu0 %v944_v37 }
  0x24   :  { %673 = vperm.xlu0 %1780, %v1904_v27   ;;  %1747 = vmatprep.subr.mxu1 %v944_v37 }
  0x25   :  { %1515 = vmatpush3.msra.mxu0 %v928_v38  ;;  %1763 = vmatpush3.msra.mxu1 %v928_v38 }
  0x26   :  { %134 = vperm.xlu1 %1783, %v1904_v27   ;;  %1516 = vmatprep.subr.mxu0 %v943_v41 }
  0x27   :  { %1748 = vmatprep.subr.mxu1 %v943_v41  ;;  %1517 = vmatpush3.msra.mxu0 %v927_v43 }
  0x28   :  { %641 = vperm.xlu0 %1780, %v1911_v33   ;;  %1764 = vmatpush3.msra.mxu1 %v927_v43 }
  0x29   :  { %1518 = vmatprep.subr.mxu0 %v942_v44  ;;  %1749 = vmatprep.subr.mxu1 %v942_v44 }
  0x2a   :  { %94 = vperm.xlu1 %1783, %v1911_v33   ;;  %1519 = vmatpush3.msra.mxu0 %v926_v47 }
  0x2b   :  { %1765 = vmatpush3.msra.mxu1 %v926_v47  ;;  %1520 = vmatprep.subr.mxu0 %v941_v49 }
  0x2c   :  { %677 = vperm.xlu0 %1780, %v1918_v39   ;;  %1750 = vmatprep.subr.mxu1 %v941_v49 }
  0x2d   :  { %1521 = vmatpush3.msra.mxu0 %v925_v50  ;;  %1766 = vmatpush3.msra.mxu1 %v925_v50 }
  0x2e   :  { %139 = vperm.xlu1 %1783, %v1918_v39   ;;  %1522 = vmatprep.subr.mxu0 %v940_v53 }
  0x2f   :  { %1751 = vmatprep.subr.mxu1 %v940_v53  ;;  %1523 = vmatpush3.msra.mxu0 %v924_v55 }
  0x30   :  { %645 = vperm.xlu0 %1780, %v1925_v45   ;;  %1767 = vmatpush3.msra.mxu1 %v924_v55 }
  0x31   :  { %1524 = vmatprep.subr.mxu0 %v939_v56  ;;  %1752 = vmatprep.subr.mxu1 %v939_v56 }
  0x32   :  { %99 = vperm.xlu1 %1783, %v1925_v45   ;;  %1525 = vmatpush3.msra.mxu0 %v923_v59 }
  0x33   :  { %1768 = vmatpush3.msra.mxu1 %v923_v59  ;;  %1526 = vmatprep.subr.mxu0 %v938_v61 }
  0x34   :  { %681 = vperm.xlu0 %1780, %v1932_v51   ;;  %1753 = vmatprep.subr.mxu1 %v938_v61 }
  0x35   :  { %1527 = vmatpush3.msra.mxu0 %v922_v62  ;;  %1769 = vmatpush3.msra.mxu1 %v922_v62 }
  0x36   :  { %144 = vperm.xlu1 %1783, %v1932_v51   ;;  %1528 = vmatprep.subr.mxu0 %v937_v1 }
  0x37   :  { %1754 = vmatprep.subr.mxu1 %v937_v1  ;;  %1529 = vmatpush3.msra.mxu0 %v921_v3 }
  0x38   :  { %649 = vperm.xlu0 %1780, %v1939_v57   ;;  %1770 = vmatpush3.msra.mxu1 %v921_v3 }
  0x39   :  { %1530 = vmatprep.subr.mxu0 %v936_v4  ;;  %1755 = vmatprep.subr.mxu1 %v936_v4 }
  0x3a   :  { %104 = vperm.xlu1 %1783, %v1939_v57   ;;  %1531 = vmatpush3.msra.mxu0 %v920_v9 }
  0x3b   :  { %1771 = vmatpush3.msra.mxu1 %v920_v9  ;;  %1660 = vmatprep.subr.mxu0 %v1305_v20 }
  0x3c   :  { %685 = vperm.xlu0 %1780, %v1946_v63   ;;  %1580 = vmatprep.subr.mxu1 %v887_v19 }
  0x3e   :  { %149 = vperm.xlu1 %1783, %v1946_v63  }
  0x40   :  { %653 = vperm.xlu0 %1780, %v69_v7  }
  0x42   :  { %109 = vperm.xlu1 %1783, %v69_v7  }
  0x44   :  { %689 = vperm.xlu0 %1780, %v78_v11  }
  0x46   :  { %154 = vperm.xlu1 %1783, %v78_v11  }
  0x48   :  { %657 = vperm.xlu0 %1780, %v70_v16  }
  0x4a   :  { %114 = vperm.xlu1 %1783, %v70_v16  }
  0x4c   :  { %693 = vperm.xlu0 %1780, %v79_v22  }
  0x4e   :  { %159 = vperm.xlu1 %1783, %v79_v22  }
  0x50   :  { %661 = vperm.xlu0 %1780, %v71_v24  }
  0x52   :  { %119 = vperm.xlu1 %1783, %v71_v24  }
  0x54   :  { %1785 = vset.pattern.permute.xlu0 %v1836_v25 }
  0x55   :  { %306 = vperm.xlu0 %1785, %v1897_v21  }
  0x56   :  { %1784 = vset.pattern.permute.xlu1 %v1836_v25 }
  0x57   :  { %302 = vperm.xlu1 %1784, %v1877_v6   ;;  %v163_v6 = vlaneseq }
  0x59   :  { %318 = vperm.xlu0 %1785, %v1939_v57   ;;  %v164_v21 = vshrl.u32 %v163_v6, 7 }
  0x5b   :  { %310 = vperm.xlu1 %1784, %v1911_v33   ;;  %v165_v26 = vsub.s32 0, %v164_v21 }
  0x5d   :  { %326 = vperm.xlu0 %1785, %v70_v16  }
  0x5f   :  { %314 = vperm.xlu1 %1784, %v1925_v45  }
  0x61   :  { %334 = vperm.xlu0 %1785, %v1875_v5   ;;  %v169_v5 = vsub.s32 1, %v164_v21 }
  0x63   :  { %322 = vperm.xlu1 %1784, %v69_v7  }
  0x65   :  { %342 = vperm.xlu0 %1785, %v1904_v27   ;;  %v81_v27 = vld [vmem:[%s2603_s1] sm:$0x3] }
  0x66   :  { %v1978_v28 = vrot.slane %v81_v27, %v165_v26  ;;  %v1980_v29 = vrot.slane %v81_v27, %v169_v5 }
  0x67   :  { %330 = vperm.xlu1 %1784, %v71_v24  }
  0x69   :  { %350 = vperm.xlu0 %1785, %v1932_v51  }
  0x6b   :  { %338 = vperm.xlu1 %1784, %v1891_v15   ;;  %v80_v15 = vld [vmem:[%s2602_s0] sm:$0x3]  ;;  %s1837_s0 = smov [#allocation5]  }
  0x6c   :  { %v1989_v35 = vrot.slane %v80_v15, %v165_v26  ;;  %v1991_v36 = vrot.slane %v80_v15, %v169_v5  ;;  %s1488_s1 = sshll.u32 %s1837_s0, 4  ;;  %s1489_s1 = int_to_ptr.vmem [resolvable:$true] %s1488_s1 }
  0x6d   :  { %358 = vperm.xlu0 %1785, %v78_v11   ;;  %s1807_s5 = scalar_lea.vmem %s1489_s1, 2048  ;;  %p1812_p6 = scmp.lt.s32.totalorder %s1489_s1, %s1489_s1 }
  0x6e   :  { %p1808_p5 = scmp.ne.s32.totalorder %s1489_s1, %s1807_s5  ;;  %p1813_p7 = scmp.lt.s32.totalorder %s1807_s5, %s1807_s5 }
  0x6f   :  { %346 = vperm.xlu1 %1784, %v1918_v39  }
  0x70   :  { %p1814_p8 = por %p1813_p7, %p1812_p6 }
  0x71   :  { %1786 = vset.pattern.permute.xlu0 %v1835_v13 }
  0x72   :  { %p1815_p9 = pnand %p1814_p8, %p1808_p5 }
  0x73   :  { %354 = vperm.xlu1 %1784, %v1946_v63  }
  0x77   :  { %362 = vperm.xlu1 %1784, %v79_v22  }
  0x8e   :  { %v125_v30 = vpop.permute.xlu0 %124 }
  0x8f   :  { %v85_v13 = vpop.permute.xlu1 %84  ;;  %v189_v33 = vsub.f32 %v125_v30, %v1978_v28  ;;  %v190_v34 = vsub.f32 %v125_v30, %v1980_v29 }
  0x90   :  { %v173_v31 = vsub.f32 %v85_v13, %v1978_v28  ;;  %v174_v32 = vsub.f32 %v85_v13, %v1980_v29 }
  0x91   :  { %v221_v37 = vand.u32 2147483647, %v189_v33  ;;  %v222_v38 = vand.u32 2147483647, %v190_v34 }
  0x92   :  { %v205_v39 = vand.u32 2147483647, %v173_v31  ;;  %v206_v40 = vand.u32 2147483647, %v174_v32 }
  0x93   :  { %v253_v41 = vsub.f32 1.0, %v221_v37  ;;  %v666_v42 = vpop.permute.xlu0 %665  ;;  %v254_v48 = vsub.f32 1.0, %v222_v38 }
  0x94   :  { %v634_v43 = vpop.permute.xlu1 %633  ;;  %v712_v44 = vsub.f32 %v666_v42, %v1989_v35  ;;  %v713_v45 = vsub.f32 %v666_v42, %v1991_v36  ;;  %v237_v52 = vsub.f32 1.0, %v205_v39  ;;  %v238_v56 = vsub.f32 1.0, %v206_v40  ;;  %v871_v42 = vld [vmem:[#allocation2 + $0x78] sm:$0xff] }
  0x95   :  { %v696_v46 = vsub.f32 %v634_v43, %v1989_v35  ;;  %v697_v47 = vsub.f32 %v634_v43, %v1991_v36  ;;  %v1997_v53 = vmax.f32 %v253_v41, 0.0  ;;  %v2001_v61 = vmax.f32 %v254_v48, 0.0  ;;  %v1289_v48 = vld [vmem:[#allocation2 + $0x278] sm:$0xff] }
  0x96   :  { %v744_v49 = vand.u32 2147483647, %v712_v44  ;;  %v745_v50 = vand.u32 2147483647, %v713_v45  ;;  %v2019_v26 = vmax.f32 %v238_v56, 0.0  ;;  %v2021_v5 = vmax.f32 %v237_v52, 0.0 }
  0x97   :  { %v728_v51 = vand.u32 2147483647, %v696_v46  ;;  %2643 = vst [vmem:[#allocation8_spill] sm:$0xff] %v1997_v53  ;;  %v729_v54 = vand.u32 2147483647, %v697_v47  ;;  %v670_v55 = vpop.permute.xlu0 %669  ;;  %2644 = vst [vmem:[#allocation9_spill] sm:$0xff] %v2001_v61 }
  0x98   :  { %v776_v57 = vsub.f32 1.0, %v744_v49  ;;  %v714_v58 = vsub.f32 %v670_v55, %v1989_v35  ;;  %v715_v59 = vsub.f32 %v670_v55, %v1991_v36  ;;  %v777_v1 = vsub.f32 1.0, %v745_v50  ;;  %v886_v47 = vld [vmem:[#allocation2 + $0xf0] sm:$0xff] }
  0x99   :  { %v130_v60 = vpop.permute.xlu1 %129  ;;  %v761_v0 = vsub.f32 1.0, %v729_v54  ;;  %v760_v3 = vsub.f32 1.0, %v728_v51  ;;  %v870_v55 = vld [vmem:[#allocation2 + $0x70] sm:$0xff] }
  0x9a   :  { %v191_v62 = vsub.f32 %v130_v60, %v1978_v28  ;;  %v192_v63 = vsub.f32 %v130_v60, %v1980_v29  ;;  %v2005_v2 = vmax.f32 %v776_v57, 0.0  ;;  %v746_v4 = vand.u32 2147483647, %v714_v58  ;;  %v1304_v56 = vld [vmem:[#allocation2 + $0x2f0] sm:$0xff] }
  0x9b   :  { %v747_v7 = vand.u32 2147483647, %v715_v59  ;;  %v638_v10 = vpop.permute.xlu0 %637  ;;  %v2007_v11 = vmax.f32 %v761_v0, 0.0  ;;  %v2009_v12 = vmax.f32 %v777_v1, 0.0  ;;  %v2015_v25 = vmax.f32 %v760_v3, 0.0 }
  0x9c   :  { %2645 = vst [vmem:[#allocation10_spill] sm:$0xff] %v2005_v2  ;;  %v223_v8 = vand.u32 2147483647, %v191_v62  ;;  %v224_v9 = vand.u32 2147483647, %v192_v63  ;;  %v778_v14 = vsub.f32 1.0, %v746_v4  ;;  %v698_v17 = vsub.f32 %v638_v10, %v1989_v35 }
  0x9d   :  { %2646 = vst [vmem:[#allocation11_spill] sm:$0xff] %v2009_v12  ;;  %v779_v16 = vsub.f32 1.0, %v747_v7  ;;  %v699_v18 = vsub.f32 %v638_v10, %v1991_v36  ;;  %v90_v19 = vpop.permute.xlu1 %89  ;;  %v889_v33 = vmul.f32 %v2007_v11, %v2019_v26  ;;  %v905_v34 = vmul.f32 %v2009_v12, %v2001_v61  ;;  %v885_v63 = vld [vmem:[#allocation2 + $0xe8] sm:$0xff]  ;;  %v1288_v7 = vld [vmem:[#allocation2 + $0x270] sm:$0xff] }
  0x9e   :  { %v255_v20 = vsub.f32 1.0, %v223_v8  ;;  %v256_v22 = vsub.f32 1.0, %v224_v9  ;;  %v175_v23 = vsub.f32 %v90_v19, %v1978_v28  ;;  %v176_v24 = vsub.f32 %v90_v19, %v1980_v29  ;;  %v869_v8 = vld [vmem:[#allocation2 + $0x68] sm:$0xff] }
  0x9f   :  { %v2017_v6 = vand.u32 2147483647, %v698_v17  ;;  %v731_v21 = vand.u32 2147483647, %v699_v18  ;;  %v2023_v27 = vmax.f32 %v778_v14, 0.0  ;;  %v674_v30 = vpop.permute.xlu0 %673  ;;  %v2027_v31 = vmax.f32 %v779_v16, 0.0  ;;  %1016 = vmatprep.mubr.f32.mxu0 %v889_v33  ;;  %1056 = vmatprep.mubr.f32.mxu1 %v905_v34 }
  0xa0   :  { %v2025_v15 = vand.u32 2147483647, %v175_v23  ;;  %v208_v13 = vand.u32 2147483647, %v176_v24  ;;  %v2033_v38 = vmax.f32 %v255_v20, 0.0  ;;  %v2035_v39 = vmax.f32 %v256_v22, 0.0 }
  0xa1   :  { %2647 = vst [vmem:[#allocation12_spill] sm:$0xff] %v2023_v27  ;;  %2648 = vst [vmem:[#allocation13_spill] sm:$0xff] %v2027_v31  ;;  %v763_v32 = vsub.f32 1.0, %v731_v21  ;;  %v135_v37 = vpop.permute.xlu1 %134  ;;  %v904_v40 = vmul.f32 %v2005_v2, %v1997_v53  ;;  %v716_v41 = vsub.f32 %v674_v30, %v1989_v35  ;;  %v762_v43 = vsub.f32 1.0, %v2017_v6  ;;  %v1303_v9 = vld [vmem:[#allocation2 + $0x2e8] sm:$0xff]  ;;  %v884_v6 = vld [vmem:[#allocation2 + $0xe0] sm:$0xff] }
  0xa2   :  { %2649 = vst [vmem:[#allocation14_spill] sm:$0xff] %v2033_v38  ;;  %2650 = vst [vmem:[#allocation15_spill] sm:$0xff] %v2035_v39  ;;  %v239_v44 = vsub.f32 1.0, %v2025_v15  ;;  %v717_v45 = vsub.f32 %v674_v30, %v1991_v36  ;;  %v888_v46 = vmul.f32 %v2015_v25, %v2021_v5  ;;  %v240_v50 = vsub.f32 1.0, %v208_v13  ;;  %v1287_v18 = vld [vmem:[#allocation2 + $0x268] sm:$0xff]  ;;  %v1302_v21 = vld [vmem:[#allocation2 + $0x2e0] sm:$0xff] }
  0xa3   :  { %v2045_v49 = vmax.f32 %v763_v32, 0.0  ;;  %1057 = vmatmul.mubr.f32.vlgmr.msra.gmra.mxu1 %v904_v40  ;;  %v748_v51 = vand.u32 2147483647, %v716_v41  ;;  %v193_v52 = vsub.f32 %v135_v37, %v1978_v28  ;;  %v642_v54 = vpop.permute.xlu0 %641  ;;  %v194_v58 = vsub.f32 %v135_v37, %v1980_v29  ;;  %v868_v34 = vld [vmem:[#allocation2 + $0x60] sm:$0xff] }
  0xa4   :  { %v749_v57 = vand.u32 2147483647, %v717_v45  ;;  %1017 = vmatmul.mubr.f32.vlgmr.msra.gmra.mxu0 %v888_v46  ;;  %v700_v59 = vsub.f32 %v642_v54, %v1989_v35  ;;  %v701_v60 = vsub.f32 %v642_v54, %v1991_v36  ;;  %1581 = vmatpush3.msra.mxu1 %v871_v42  ;;  %v907_v3 = vmul.f32 %v2027_v31, %v2035_v39  ;;  %v883_v45 = vld [vmem:[#allocation2 + $0xd8] sm:$0xff]  ;;  %v1286_v46 = vld [vmem:[#allocation2 + $0x260] sm:$0xff] }
  0xa5   :  { %v95_v62 = vpop.permute.xlu1 %94  ;;  %v780_v0 = vsub.f32 1.0, %v748_v51  ;;  %v225_v1 = vand.u32 2147483647, %v193_v52  ;;  %v906_v4 = vmul.f32 %v2023_v27, %v2033_v38  ;;  %1582 = vmatprep.subr.mxu1 %v886_v47  ;;  %1661 = vmatpush3.msra.mxu0 %v1289_v48  ;;  %v226_v14 = vand.u32 2147483647, %v194_v58 }
  0xa6   :  { %v781_v10 = vsub.f32 1.0, %v749_v57  ;;  %v732_v16 = vand.u32 2147483647, %v700_v59  ;;  %v177_v17 = vsub.f32 %v95_v62, %v1978_v28  ;;  %1583 = vmatpush3.msra.mxu1 %v870_v55  ;;  %1662 = vmatprep.subr.mxu0 %v1304_v56  ;;  %v2056_v19 = vmax.f32 %v240_v50, 0.0  ;;  %v867_v50 = vld [vmem:[#allocation2 + $0x58] sm:$0xff] }
  0xa7   :  { %v257_v20 = vsub.f32 1.0, %v225_v1  ;;  %v733_v22 = vand.u32 2147483647, %v701_v60  ;;  %1061 = vmatprep.mubr.f32.mxu1 %v907_v3  ;;  %v178_v23 = vsub.f32 %v95_v62, %v1980_v29  ;;  %v678_v24 = vpop.permute.xlu0 %677  ;;  %1584 = vmatprep.subr.mxu1 %v885_v63  ;;  %v2059_v15 = vmax.f32 %v762_v43, 0.0  ;;  %v1301_v57 = vld [vmem:[#allocation2 + $0x2d8] sm:$0xff] }
  0xa8   :  { %v2061_v13 = vmax.f32 %v239_v44, 0.0  ;;  %v258_v30 = vsub.f32 1.0, %v226_v14  ;;  %1062 = vmatmul.mubr.f32.gmra.mxu1 %v906_v4  ;;  %v209_v32 = vand.u32 2147483647, %v177_v17  ;;  %1663 = vmatpush3.msra.mxu0 %v1288_v7  ;;  %v764_v37 = vsub.f32 1.0, %v732_v16  ;;  %v1285_v1 = vld [vmem:[#allocation2 + $0x258] sm:$0xff] }
  0xa9   :  { %v140_v33 = vpop.permute.xlu1 %139  ;;  %v765_v40 = vsub.f32 1.0, %v733_v22  ;;  %v210_v41 = vand.u32 2147483647, %v178_v23  ;;  %v718_v42 = vsub.f32 %v678_v24, %v1989_v35  ;;  %1585 = vmatpush3.msra.mxu1 %v869_v8  ;;  %1664 = vmatprep.subr.mxu0 %v1303_v9  ;;  %v2064_v47 = vmax.f32 %v780_v0, 0.0  ;;  %v882_v0 = vld [vmem:[#allocation2 + $0xd0] sm:$0xff] }
  0xaa   :  { %v2066_v43 = vmax.f32 %v781_v10, 0.0  ;;  %v2068_v44 = vmax.f32 %v258_v30, 0.0  ;;  %v719_v48 = vsub.f32 %v678_v24, %v1991_v36  ;;  %1586 = vmatprep.subr.mxu1 %v884_v6  ;;  %1665 = vmatpush3.msra.mxu0 %v1287_v18  ;;  %v2071_v51 = vmax.f32 %v257_v20, 0.0  ;;  %v866_v9 = vld [vmem:[#allocation2 + $0x50] sm:$0xff]  ;;  %v881_v30 = vld [vmem:[#allocation2 + $0xc8] sm:$0xff] }
  0xab   :  { %2651 = vst [vmem:[#allocation16_spill] sm:$0xff] %v2064_v47  ;;  %v241_v52 = vsub.f32 1.0, %v209_v32  ;;  %v2073_v54 = vand.u32 2147483647, %v718_v42  ;;  %v891_v55 = vmul.f32 %v2045_v49, %v2056_v19  ;;  %v646_v56 = vpop.permute.xlu0 %645  ;;  %1587 = vmatpush3.msra.mxu1 %v868_v34  ;;  %1666 = vmatprep.subr.mxu0 %v1302_v21  ;;  %v242_v58 = vsub.f32 1.0, %v210_v41  ;;  %v1300_v18 = vld [vmem:[#allocation2 + $0x2d0] sm:$0xff] }
  0xac   :  { %2652 = vst [vmem:[#allocation17_spill] sm:$0xff] %v2066_v43  ;;  %2653 = vst [vmem:[#allocation18_spill] sm:$0xff] %v2068_v44  ;;  %v751_v59 = vand.u32 2147483647, %v719_v48  ;;  %v890_v60 = vmul.f32 %v2059_v15, %v2061_v13  ;;  %v195_v62 = vsub.f32 %v140_v33, %v1978_v28  ;;  %1588 = vmatprep.subr.mxu1 %v883_v45  ;;  %1667 = vmatpush3.msra.mxu0 %v1286_v46  ;;  %v1284_v20 = vld [vmem:[#allocation2 + $0x250] sm:$0xff]  ;;  %v865_v41 = vld [vmem:[#allocation2 + $0x48] sm:$0xff] }
  0xad   :  { %2654 = vst [vmem:[#allocation19_spill] sm:$0xff] %v2071_v51  ;;  %v100_v63 = vpop.permute.xlu1 %99  ;;  %v2080_v3 = vmax.f32 %v764_v37, 0.0  ;;  %v2082_v4 = vmax.f32 %v765_v40, 0.0  ;;  %1021 = vmatprep.mubr.f32.mxu0 %v891_v55  ;;  %v196_v7 = vsub.f32 %v140_v33, %v1980_v29  ;;  %v702_v8 = vsub.f32 %v646_v56, %v1989_v35  ;;  %1589 = vmatpush3.msra.mxu1 %v867_v50  ;;  %v1299_v42 = vld [vmem:[#allocation2 + $0x2c8] sm:$0xff]  ;;  %v1298_v55 = vld [vmem:[#allocation2 + $0x2c0] sm:$0xff] }
  0xae   :  { %v782_v10 = vsub.f32 1.0, %v2073_v54  ;;  %1022 = vmatmul.mubr.f32.gmra.mxu0 %v890_v60  ;;  %v227_v14 = vand.u32 2147483647, %v195_v62  ;;  %v703_v16 = vsub.f32 %v646_v56, %v1991_v36  ;;  %v909_v17 = vmul.f32 %v2066_v43, %v2068_v44  ;;  %1668 = vmatprep.subr.mxu0 %v1301_v57  ;;  %v1283_v54 = vld [vmem:[#allocation2 + $0x248] sm:$0xff]  ;;  %v864_v60 = vld [vmem:[#allocation2 + $0x40] sm:$0xff]  ;;  %v879_v62 = vld [vmem:[#allocation2 + $0xb8] sm:$0xff] }
  0xaf   :  { %v783_v22 = vsub.f32 1.0, %v751_v59  ;;  %v228_v23 = vand.u32 2147483647, %v196_v7  ;;  %v734_v24 = vand.u32 2147483647, %v702_v8  ;;  %v908_v6 = vmul.f32 %v2064_v47, %v2071_v51  ;;  %v682_v21 = vpop.permute.xlu0 %681  ;;  %1590 = vmatprep.subr.mxu1 %v882_v0  ;;  %1669 = vmatpush3.msra.mxu0 %v1285_v1 }
  0xb0   :  { %v2092_v32 = vmax.f32 %v241_v52, 0.0  ;;  %v2094_v33 = vmax.f32 %v242_v58, 0.0  ;;  %v735_v34 = vand.u32 2147483647, %v703_v16  ;;  %1066 = vmatprep.mubr.f32.mxu1 %v909_v17  ;;  %v179_v37 = vsub.f32 %v100_v63, %v1978_v28  ;;  %1591 = vmatpush3.msra.mxu1 %v866_v9  ;;  %v880_v52 = vld [vmem:[#allocation2 + $0xc0] sm:$0xff] }
  0xb1   :  { %v145_v40 = vpop.permute.xlu1 %144  ;;  %v259_v45 = vsub.f32 1.0, %v227_v14  ;;  %v260_v46 = vsub.f32 1.0, %v228_v23  ;;  %1067 = vmatmul.mubr.f32.gmra.mxu1 %v908_v6  ;;  %v180_v48 = vsub.f32 %v100_v63, %v1980_v29  ;;  %v720_v50 = vsub.f32 %v682_v21, %v1989_v35  ;;  %1670 = vmatprep.subr.mxu0 %v1300_v18  ;;  %v1282_v6 = vld [vmem:[#allocation2 + $0x240] sm:$0xff] }
  0xb2   :  { %v766_v56 = vsub.f32 1.0, %v734_v24  ;;  %v767_v57 = vsub.f32 1.0, %v735_v34  ;;  %v211_v58 = vand.u32 2147483647, %v179_v37  ;;  %v721_v59 = vsub.f32 %v682_v21, %v1991_v36  ;;  %1592 = vmatprep.subr.mxu1 %v881_v30  ;;  %1671 = vmatpush3.msra.mxu0 %v1284_v20  ;;  %v878_v21 = vld [vmem:[#allocation2 + $0xb0] sm:$0xff] }
  0xb3   :  { %v2100_v0 = vmax.f32 %v782_v10, 0.0  ;;  %v2102_v1 = vmax.f32 %v783_v22, 0.0  ;;  %v212_v63 = vand.u32 2147483647, %v180_v48  ;;  %v2104_v7 = vand.u32 2147483647, %v720_v50  ;;  %v650_v8 = vpop.permute.xlu0 %649  ;;  %1593 = vmatpush3.msra.mxu1 %v865_v41  ;;  %1672 = vmatprep.subr.mxu0 %v1299_v42 }
  0xb4   :  { %v2106_v9 = vmax.f32 %v260_v46, 0.0  ;;  %v243_v14 = vsub.f32 1.0, %v211_v58  ;;  %v2108_v16 = vand.u32 2147483647, %v721_v59  ;;  %v893_v17 = vmul.f32 %v2082_v4, %v2094_v33  ;;  %1594 = vmatprep.subr.mxu1 %v880_v52  ;;  %1673 = vmatpush3.msra.mxu0 %v1283_v54  ;;  %v863_v10 = vld [vmem:[#allocation2 + $0x38] sm:$0xff] }
  0xb5   :  { %2655 = vst [vmem:[#allocation20_spill] sm:$0xff] %v2100_v0  ;;  %2656 = vst [vmem:[#allocation21_spill] sm:$0xff] %v2102_v1  ;;  %v2112_v18 = vpop.permute.xlu1 %104  ;;  %v2114_v20 = vmax.f32 %v259_v45, 0.0  ;;  %v244_v22 = vsub.f32 1.0, %v212_v63  ;;  %v892_v23 = vmul.f32 %v2080_v3, %v2092_v32  ;;  %v197_v24 = vsub.f32 %v145_v40, %v1978_v28  ;;  %1595 = vmatpush3.msra.mxu1 %v864_v60  ;;  %v1297_v42 = vld [vmem:[#allocation2 + $0x2b8] sm:$0xff]  ;;  %v862_v45 = vld [vmem:[#allocation2 + $0x30] sm:$0xff] }
  0xb6   :  { %2657 = vst [vmem:[#allocation22_spill] sm:$0xff] %v2106_v9  ;;  %1674 = vmatprep.subr.mxu0 %v1298_v55  ;;  %v2119_v30 = vmax.f32 %v766_v56, 0.0  ;;  %v2121_v34 = vmax.f32 %v767_v57, 0.0  ;;  %1026 = vmatprep.mubr.f32.mxu0 %v893_v17  ;;  %v198_v37 = vsub.f32 %v145_v40, %v1980_v29  ;;  %v704_v41 = vsub.f32 %v650_v8, %v1989_v35  ;;  %v1281_v55 = vld [vmem:[#allocation2 + $0x238] sm:$0xff]  ;;  %v1296_v60 = vld [vmem:[#allocation2 + $0x2b0] sm:$0xff] }
  0xb7   :  { %2658 = vst [vmem:[#allocation23_spill] sm:$0xff] %v2114_v20  ;;  %1596 = vmatprep.subr.mxu1 %v879_v62  ;;  %v2125_v46 = vmax.f32 %v243_v14, 0.0  ;;  %v784_v48 = vsub.f32 1.0, %v2104_v7  ;;  %1027 = vmatmul.mubr.f32.gmra.mxu0 %v892_v23  ;;  %v229_v50 = vand.u32 2147483647, %v197_v24  ;;  %v705_v52 = vsub.f32 %v650_v8, %v1991_v36  ;;  %v686_v54 = vpop.permute.xlu0 %685  ;;  %v877_v14 = vld [vmem:[#allocation2 + $0xa8] sm:$0xff] }
  0xb8   :  { %1597 = vmatpush3.msra.mxu1 %v863_v10  ;;  %v785_v56 = vsub.f32 1.0, %v2108_v16  ;;  %v230_v57 = vand.u32 2147483647, %v198_v37  ;;  %v736_v40 = vand.u32 2147483647, %v704_v41  ;;  %v911_v58 = vmul.f32 %v2102_v1, %v2106_v9  ;;  %1675 = vmatpush3.msra.mxu0 %v1282_v6  ;;  %v1280_v16 = vld [vmem:[#allocation2 + $0x230] sm:$0xff] }
  0xb9   :  { %v2132_v59 = vpop.permute.xlu1 %149  ;;  %1598 = vmatprep.subr.mxu1 %v878_v21  ;;  %v2134_v62 = vmax.f32 %v244_v22, 0.0  ;;  %v737_v63 = vand.u32 2147483647, %v705_v52  ;;  %v910_v7 = vmul.f32 %v2100_v0, %v2114_v20  ;;  %v181_v8 = vsub.f32 %v2112_v18, %v1978_v28  ;;  %1676 = vmatprep.subr.mxu0 %v1297_v42  ;;  %v861_v24 = vld [vmem:[#allocation2 + $0x28] sm:$0xff] }
  0xba   :  { %1599 = vmatpush3.msra.mxu1 %v862_v45  ;;  %v261_v17 = vsub.f32 1.0, %v229_v50  ;;  %v262_v10 = vsub.f32 1.0, %v230_v57  ;;  %1071 = vmatprep.mubr.f32.mxu1 %v911_v58  ;;  %v182_v23 = vsub.f32 %v2112_v18, %v1980_v29  ;;  %v722_v22 = vsub.f32 %v686_v54, %v1989_v35  ;;  %v1295_v6 = vld [vmem:[#allocation2 + $0x2a8] sm:$0xff]  ;;  %v876_v50 = vld [vmem:[#allocation2 + $0xa0] sm:$0xff] }
  0xbb   :  { %1677 = vmatpush3.msra.mxu0 %v1281_v55  ;;  %v1279_v21 = vld [vmem:[#allocation2 + $0x228] sm:$0xff]  ;;  %v768_v37 = vsub.f32 1.0, %v736_v40  ;;  %v769_v41 = vsub.f32 1.0, %v737_v63  ;;  %1072 = vmatmul.mubr.f32.gmra.mxu1 %v910_v7  ;;  %v213_v52 = vand.u32 2147483647, %v181_v8  ;;  %v723_v42 = vsub.f32 %v686_v54, %v1991_v36  ;;  %v654_v45 = vpop.permute.xlu0 %653  ;;  %v860_v57 = vld [vmem:[#allocation2 + $0x20] sm:$0xff] }
  0xbc   :  { %1678 = vmatprep.subr.mxu0 %v1296_v60  ;;  %v2144_v58 = vmax.f32 %v784_v48, 0.0  ;;  %v2146_v0 = vmax.f32 %v785_v56, 0.0  ;;  %v214_v18 = vand.u32 2147483647, %v182_v23  ;;  %v2148_v20 = vand.u32 2147483647, %v722_v22  ;;  %1600 = vmatprep.subr.mxu1 %v877_v14 }
  0xbd   :  { %v2150_v55 = vpop.permute.xlu1 %109  ;;  %1679 = vmatpush3.msra.mxu0 %v1280_v16  ;;  %v2152_v40 = vmax.f32 %v262_v10, 0.0  ;;  %v245_v63 = vsub.f32 1.0, %v213_v52  ;;  %v2154_v7 = vand.u32 2147483647, %v723_v42  ;;  %v895_v54 = vmul.f32 %v2121_v34, %v2134_v62  ;;  %1601 = vmatpush3.msra.mxu1 %v861_v24  ;;  %v1294_v48 = vld [vmem:[#allocation2 + $0x2a0] sm:$0xff]  ;;  %v875_v16 = vld [vmem:[#allocation2 + $0x98] sm:$0xff] }
  0xbe   :  { %2659 = vst [vmem:[#allocation24_spill] sm:$0xff] %v2144_v58  ;;  %2660 = vst [vmem:[#allocation25_spill] sm:$0xff] %v2146_v0  ;;  %1680 = vmatprep.subr.mxu0 %v1295_v6  ;;  %v2158_v56 = vmax.f32 %v261_v17, 0.0  ;;  %v246_v60 = vsub.f32 1.0, %v214_v18  ;;  %v894_v8 = vmul.f32 %v2119_v30, %v2125_v46  ;;  %v199_v14 = vsub.f32 %v2132_v59, %v1978_v28  ;;  %v1278_v10 = vld [vmem:[#allocation2 + $0x220] sm:$0xff]  ;;  %v859_v52 = vld [vmem:[#allocation2 + $0x18] sm:$0xff] }
  0xbf   :  { %2661 = vst [vmem:[#allocation26_spill] sm:$0xff] %v2152_v40  ;;  %1602 = vmatprep.subr.mxu1 %v876_v50  ;;  %1681 = vmatpush3.msra.mxu0 %v1279_v21  ;;  %v2164_v23 = vmax.f32 %v768_v37, 0.0  ;;  %v2166_v22 = vmax.f32 %v769_v41, 0.0  ;;  %v200_v17 = vsub.f32 %v2132_v59, %v1980_v29  ;;  %v706_v24 = vsub.f32 %v654_v45, %v1989_v35  ;;  %v690_v6 = vpop.permute.xlu0 %689  ;;  %v1293_v42 = vld [vmem:[#allocation2 + $0x298] sm:$0xff] }
  0xc0   :  { %2662 = vst [vmem:[#allocation27_spill] sm:$0xff] %v2158_v56  ;;  %1031 = vmatprep.mubr.f32.mxu0 %v895_v54  ;;  %1603 = vmatpush3.msra.mxu1 %v860_v57  ;;  %v2171_v18 = vmax.f32 %v245_v63, 0.0  ;;  %v786_v21 = vsub.f32 1.0, %v2148_v20  ;;  %v231_v50 = vand.u32 2147483647, %v199_v14  ;;  %v707_v37 = vsub.f32 %v654_v45, %v1991_v36  ;;  %v874_v54 = vld [vmem:[#allocation2 + $0x90] sm:$0xff] }
  0xc1   :  { %1032 = vmatmul.mubr.f32.gmra.mxu0 %v894_v8  ;;  %v2175_v41 = vpop.permute.xlu1 %154  ;;  %1682 = vmatprep.subr.mxu0 %v1294_v48  ;;  %v2177_v1 = vmax.f32 %v246_v60, 0.0  ;;  %v787_v59 = vsub.f32 1.0, %v2154_v7  ;;  %v232_v9 = vand.u32 2147483647, %v200_v17  ;;  %v913_v57 = vmul.f32 %v2146_v0, %v2152_v40  ;;  %v1277_v63 = vld [vmem:[#allocation2 + $0x218] sm:$0xff]  ;;  %v858_v60 = vld [vmem:[#allocation2 + $0x10] sm:$0xff] }
  0xc2   :  { %1604 = vmatprep.subr.mxu1 %v875_v16  ;;  %1683 = vmatpush3.msra.mxu0 %v1278_v10  ;;  %v2182_v20 = vand.u32 2147483647, %v706_v24  ;;  %v739_v8 = vand.u32 2147483647, %v707_v37  ;;  %v912_v45 = vmul.f32 %v2144_v58, %v2158_v56  ;;  %v183_v48 = vsub.f32 %v2150_v55, %v1978_v28  ;;  %v1292_v7 = vld [vmem:[#allocation2 + $0x290] sm:$0xff]  ;;  %v873_v37 = vld [vmem:[#allocation2 + $0x88] sm:$0xff] }
  0xc3   :  { %1605 = vmatpush3.msra.mxu1 %v859_v52  ;;  %1684 = vmatprep.subr.mxu0 %v1293_v42  ;;  %v263_v14 = vsub.f32 1.0, %v231_v50  ;;  %v264_v17 = vsub.f32 1.0, %v232_v9  ;;  %v184_v16 = vsub.f32 %v2150_v55, %v1980_v29  ;;  %v724_v10 = vsub.f32 %v690_v6, %v1989_v35  ;;  %v658_v24 = vpop.permute.xlu0 %657  ;;  %v1276_v0 = vld [vmem:[#allocation2 + $0x210] sm:$0xff]  ;;  %v857_v42 = vld [vmem:[#allocation2 + $0x8] sm:$0xff]  ;;  %v872_v50 = vld [vmem:[#allocation2 + $0x80] sm:$0xff] }
  0xc4   :  { %1076 = vmatprep.mubr.f32.mxu1 %v913_v57  ;;  %1606 = vmatprep.subr.mxu1 %v874_v54  ;;  %v771_v58 = vsub.f32 1.0, %v739_v8  ;;  %v215_v56 = vand.u32 2147483647, %v183_v48  ;;  %v725_v52 = vsub.f32 %v690_v6, %v1991_v36  ;;  %v1291_v40 = vld [vmem:[#allocation2 + $0x288] sm:$0xff]  ;;  %v2192_v9 = vmax.f32 %v786_v21, 0.0 }
  0xc5   :  { %1077 = vmatmul.mubr.f32.gmra.mxu1 %v912_v45  ;;  %1685 = vmatpush3.msra.mxu0 %v1277_v63  ;;  %v2194_v57 = vmax.f32 %v787_v59, 0.0  ;;  %v216_v55 = vand.u32 2147483647, %v184_v16  ;;  %v756_v47 = vand.u32 2147483647, %v724_v10  ;;  %v115_v51 = vpop.permute.xlu1 %114  ;;  %v2196_v54 = vmax.f32 %v264_v17, 0.0 }
  0xc6   :  { %2663 = vst [vmem:[#allocation28_spill] sm:$0xff] %v2192_v9  ;;  %1607 = vmatpush3.msra.mxu1 %v858_v60  ;;  %1686 = vmatprep.subr.mxu0 %v1292_v7  ;;  %v770_v8 = vsub.f32 1.0, %v2182_v20  ;;  %v757_v45 = vand.u32 2147483647, %v725_v52  ;;  %v897_v6 = vmul.f32 %v2166_v22, %v2177_v1  ;;  %v856_v63 = vld [vmem:[#allocation2] sm:$0xff]  ;;  %v2201_v21 = vmax.f32 %v263_v14, 0.0 }
  0xc7   :  { %2664 = vst [vmem:[#allocation29_spill] sm:$0xff] %v2194_v57  ;;  %2665 = vst [vmem:[#allocation30_spill] sm:$0xff] %v2196_v54  ;;  %1608 = vmatprep.subr.mxu1 %v873_v37  ;;  %1687 = vmatpush3.msra.mxu0 %v1276_v0  ;;  %v248_v59 = vsub.f32 1.0, %v216_v55  ;;  %v896_v48 = vmul.f32 %v2164_v23, %v2171_v18  ;;  %v201_v60 = vsub.f32 %v2175_v41, %v1978_v28  ;;  %v1275_v7 = vld [vmem:[#allocation2 + $0x208] sm:$0xff]  ;;  %v1290_v16 = vld [vmem:[#allocation2 + $0x280] sm:$0xff] }
  0xc8   :  { %2666 = vst [vmem:[#allocation31_spill] sm:$0xff] %v2201_v21  ;;  %1609 = vmatpush3.msra.mxu1 %v857_v42  ;;  %1688 = vmatprep.subr.mxu0 %v1291_v40  ;;  %v2207_v20 = vmax.f32 %v771_v58, 0.0  ;;  %v247_v17 = vsub.f32 1.0, %v215_v56  ;;  %v202_v0 = vsub.f32 %v2175_v41, %v1980_v29  ;;  %v708_v14 = vsub.f32 %v658_v24, %v1989_v35  ;;  %v694_v42 = vpop.permute.xlu0 %693  ;;  %v1274_v40 = vld [vmem:[#allocation2 + $0x200] sm:$0xff] }
  0xc9   :  { %1036 = vmatprep.mubr.f32.mxu0 %v897_v6  ;;  %1610 = vmatprep.subr.mxu1 %v872_v50  ;;  %v788_v10 = vsub.f32 1.0, %v756_v47  ;;  %v789_v37 = vsub.f32 1.0, %v757_v45  ;;  %v233_v52 = vand.u32 2147483647, %v201_v60  ;;  %v709_v55 = vsub.f32 %v658_v24, %v1991_v36 }
  0xca   :  { %1037 = vmatmul.mubr.f32.gmra.mxu0 %v896_v48  ;;  %1611 = vmatpush3.msra.mxu1 %v856_v63  ;;  %v2213_v58 = vmax.f32 %v248_v59, 0.0  ;;  %v234_v56 = vand.u32 2147483647, %v202_v0  ;;  %v740_v6 = vand.u32 2147483647, %v708_v14  ;;  %v915_v41 = vmul.f32 %v2194_v57, %v2196_v54  ;;  %v160_v48 = vpop.permute.xlu1 %159 }
  0xcb   :  { %1689 = vmatpush3.msra.mxu0 %v1275_v7  ;;  %v265_v43 = vsub.f32 1.0, %v233_v52  ;;  %v741_v50 = vand.u32 2147483647, %v709_v55  ;;  %v914_v47 = vmul.f32 %v2192_v9, %v2201_v21  ;;  %v185_v45 = vsub.f32 %v115_v51, %v1978_v28 }
  0xcc   :  { %1690 = vmatprep.subr.mxu0 %v1290_v16  ;;  %v2220_v24 = vmax.f32 %v770_v8, 0.0  ;;  %v2222_v63 = vmax.f32 %v247_v17, 0.0  ;;  %v266_v59 = vsub.f32 1.0, %v234_v56  ;;  %1081 = vmatprep.mubr.f32.mxu1 %v915_v41  ;;  %v186_v60 = vsub.f32 %v115_v51, %v1980_v29 }
  0xcd   :  { %1691 = vmatpush3.msra.mxu0 %v1274_v40  ;;  %v2225_v0 = vmax.f32 %v788_v10, 0.0  ;;  %v773_v7 = vsub.f32 1.0, %v741_v50  ;;  %1082 = vmatmul.mubr.f32.gmra.mxu1 %v914_v47  ;;  %v217_v14 = vand.u32 2147483647, %v185_v45  ;;  %v727_v52 = vsub.f32 %v694_v42, %v1991_v36  ;;  %v662_v10 = vpop.permute.xlu0 %661 }
  0xce   :  { %v2228_v55 = vmax.f32 %v789_v37, 0.0  ;;  %v772_v9 = vsub.f32 1.0, %v740_v6  ;;  %v218_v16 = vand.u32 2147483647, %v186_v60  ;;  %v726_v8 = vsub.f32 %v694_v42, %v1989_v35  ;;  %v120_v42 = vpop.permute.xlu1 %119 }
  0xcf   :  { %2667 = vst [vmem:[#allocation32_spill] sm:$0xff] %v2225_v0  ;;  %v2231_v17 = vmax.f32 %v265_v43, 0.0  ;;  %v2233_v56 = vmax.f32 %v266_v59, 0.0  ;;  %v249_v41 = vsub.f32 1.0, %v217_v14  ;;  %v899_v51 = vmul.f32 %v2207_v20, %v2213_v58 }
  0xd0   :  { %2668 = vst [vmem:[#allocation33_spill] sm:$0xff] %v2228_v55  ;;  %v250_v40 = vsub.f32 1.0, %v218_v16  ;;  %v759_v50 = vand.u32 2147483647, %v727_v52  ;;  %v898_v47 = vmul.f32 %v2220_v24, %v2222_v63  ;;  %v203_v37 = vsub.f32 %v160_v48, %v1978_v28 }
  0xd1   :  { %2669 = vst [vmem:[#allocation34_spill] sm:$0xff] %v2231_v17  ;;  %2670 = vst [vmem:[#allocation35_spill] sm:$0xff] %v2233_v56  ;;  %v2240_v6 = vmax.f32 %v773_v7, 0.0  ;;  %1041 = vmatprep.mubr.f32.mxu0 %v899_v51  ;;  %v204_v43 = vsub.f32 %v160_v48, %v1980_v29  ;;  %v758_v59 = vand.u32 2147483647, %v726_v8  ;;  %v711_v14 = vsub.f32 %v662_v10, %v1991_v36 }
  0xd2   :  { %v2243_v45 = vmax.f32 %v250_v40, 0.0  ;;  %1042 = vmatmul.mubr.f32.gmra.mxu0 %v898_v47  ;;  %v235_v60 = vand.u32 2147483647, %v203_v37  ;;  %v2246_v16 = vmax.f32 %v772_v9, 0.0  ;;  %v2248_v52 = vmax.f32 %v249_v41, 0.0 }
  0xd3   :  { %v236_v21 = vand.u32 2147483647, %v204_v43  ;;  %v917_v7 = vmul.f32 %v2228_v55, %v2233_v56  ;;  %v791_v57 = vsub.f32 1.0, %v759_v50  ;;  %v710_v51 = vsub.f32 %v662_v10, %v1989_v35  ;;  %v303_v50 = vpop.permute.xlu1 %302 }
  0xd4   :  { %v916_v48 = vmul.f32 %v2225_v0, %v2231_v17  ;;  %v187_v8 = vsub.f32 %v120_v42, %v1978_v28  ;;  %v743_v47 = vand.u32 2147483647, %v711_v14  ;;  %v188_v9 = vsub.f32 %v120_v42, %v1980_v29 }
  0xd5   :  { %v268_v40 = vsub.f32 1.0, %v236_v21  ;;  %1086 = vmatprep.mubr.f32.mxu1 %v917_v7  ;;  %v901_v41 = vmul.f32 %v2240_v6, %v2243_v45  ;;  %v790_v37 = vsub.f32 1.0, %v758_v59  ;;  %v267_v43 = vsub.f32 1.0, %v235_v60  ;;  %v307_v59 = vpop.permute.xlu0 %306 }
  0xd6   :  { %1087 = vmatmul.mubr.f32.gmra.mxu1 %v916_v48  ;;  %v220_v55 = vand.u32 2147483647, %v188_v9  ;;  %v2259_v10 = vmax.f32 %v791_v57, 0.0  ;;  %v742_v0 = vand.u32 2147483647, %v710_v51  ;;  %v775_v21 = vsub.f32 1.0, %v743_v47 }
  0xd7   :  { %1046 = vmatprep.mubr.f32.mxu0 %v901_v41  ;;  %v2261_v56 = vmax.f32 %v268_v40, 0.0  ;;  %v219_v17 = vand.u32 2147483647, %v187_v8  ;;  %v900_v42 = vmul.f32 %v2246_v16, %v2248_v52  ;;  %v2265_v7 = vmax.f32 %v790_v37, 0.0 }
  0xd8   :  { %2671 = vst [vmem:[#allocation36_spill] sm:$0xff] %v2259_v10  ;;  %v252_v14 = vsub.f32 1.0, %v220_v55  ;;  %v2267_v54 = vmax.f32 %v267_v43, 0.0  ;;  %v376_v60 = vsub.f32 %v303_v50, %v1989_v35  ;;  %v504_v57 = vsub.f32 %v303_v50, %v1978_v28 }
  0xd9   :  { %2672 = vst [vmem:[#allocation37_spill] sm:$0xff] %v2261_v56  ;;  %2673 = vst [vmem:[#allocation38_spill] sm:$0xff] %v2265_v7  ;;  %1047 = vmatmul.mubr.f32.gmra.mxu0 %v900_v42  ;;  %v774_v48 = vsub.f32 1.0, %v742_v0  ;;  %v251_v40 = vsub.f32 1.0, %v219_v17  ;;  %v919_v51 = vmul.f32 %v2259_v10, %v2261_v56  ;;  %v2273_v8 = vmax.f32 %v775_v21, 0.0  ;;  %v319_v17 = vpop.permute.xlu0 %318 }
  0xda   :  { %2674 = vst [vmem:[#allocation39_spill] sm:$0xff] %v2267_v54  ;;  %v2275_v55 = vmax.f32 %v252_v14, 0.0  ;;  %v408_v47 = vand.u32 2147483647, %v376_v60  ;;  %v918_v9 = vmul.f32 %v2265_v7, %v2267_v54  ;;  %v378_v41 = vsub.f32 %v307_v59, %v1989_v35 }
  0xdb   :  { %2675 = vst [vmem:[#allocation40_spill] sm:$0xff] %v2273_v8  ;;  %1091 = vmatprep.mubr.f32.mxu1 %v919_v51  ;;  %v536_v37 = vand.u32 2147483647, %v504_v57  ;;  %v2280_v43 = vmax.f32 %v774_v48, 0.0  ;;  %v2282_v42 = vmax.f32 %v251_v40, 0.0  ;;  %v377_v0 = vsub.f32 %v303_v50, %v1991_v36  ;;  %v311_v48 = vpop.permute.xlu1 %310 }
  0xdc   :  { %2676 = vst [vmem:[#allocation41_spill] sm:$0xff] %v2275_v55  ;;  %1092 = vmatmul.mubr.f32.gmra.mxu1 %v918_v9  ;;  %v379_v21 = vsub.f32 %v307_v59, %v1991_v36  ;;  %v440_v14 = vsub.f32 1.0, %v408_v47  ;;  %v505_v60 = vsub.f32 %v303_v50, %v1980_v29  ;;  %v903_v51 = vmul.f32 %v2273_v8, %v2275_v55 }
  0xdd   :  { %2677 = vst [vmem:[#allocation42_spill] sm:$0xff] %v2280_v43  ;;  %2678 = vst [vmem:[#allocation43_spill] sm:$0xff] %v2282_v42  ;;  %v506_v7 = vsub.f32 %v307_v59, %v1978_v28  ;;  %v507_v57 = vsub.f32 %v307_v59, %v1980_v29  ;;  %v2291_v54 = vand.u32 2147483647, %v378_v41  ;;  %v568_v40 = vsub.f32 1.0, %v536_v37 }
  0xde   :  { %v384_v10 = vsub.f32 %v319_v17, %v1989_v35  ;;  %v385_v9 = vsub.f32 %v319_v17, %v1991_v36  ;;  %1051 = vmatprep.mubr.f32.mxu0 %v903_v51  ;;  %v409_v56 = vand.u32 2147483647, %v377_v0  ;;  %v512_v47 = vsub.f32 %v319_v17, %v1978_v28 }
  0xdf   :  { %v513_v50 = vsub.f32 %v319_v17, %v1980_v29  ;;  %v902_v44 = vmul.f32 %v2280_v43, %v2282_v42  ;;  %v411_v27 = vand.u32 2147483647, %v379_v21  ;;  %v472_v38 = vmax.f32 %v440_v14, 0.0  ;;  %v327_v17 = vpop.permute.xlu0 %326 }
  0xe0   :  { %v537_v59 = vand.u32 2147483647, %v505_v60  ;;  %v380_v41 = vsub.f32 %v311_v48, %v1989_v35  ;;  %v538_v31 = vand.u32 2147483647, %v506_v7  ;;  %v539_v37 = vand.u32 2147483647, %v507_v57 }
  0xe1   :  { %v381_v39 = vsub.f32 %v311_v48, %v1991_v36  ;;  %v508_v2 = vsub.f32 %v311_v48, %v1978_v28  ;;  %1052 = vmatmul.mubr.f32.gmra.mxu0 %v902_v44  ;;  %v600_v0 = vmax.f32 %v568_v40, 0.0  ;;  %v2302_v51 = vand.u32 2147483647, %v384_v10  ;;  %v315_v40 = vpop.permute.xlu1 %314 }
  0xe2   :  { %v2304_v53 = vand.u32 2147483647, %v385_v9  ;;  %v2306_v12 = vand.u32 2147483647, %v512_v47  ;;  %v2308_v21 = vand.u32 2147483647, %v513_v50  ;;  %v824_v60 = vmul.f32 %v472_v38, %v2021_v5 }
  0xe3   :  { %v441_v14 = vsub.f32 1.0, %v409_v56  ;;  %v2311_v7 = vand.u32 2147483647, %v380_v41  ;;  %v509_v57 = vsub.f32 %v311_v48, %v1980_v29  ;;  %v569_v61 = vsub.f32 1.0, %v537_v59 }
  0xe4   :  { %v413_v43 = vand.u32 2147483647, %v381_v39  ;;  %v2314_v44 = vand.u32 2147483647, %v508_v2  ;;  %v388_v10 = vsub.f32 %v327_v17, %v1989_v35  ;;  %v1242_v47 = vmul.f32 %v2015_v25, %v600_v0 }
  0xe5   :  { %v473_v9 = vmax.f32 %v441_v14, 0.0  ;;  %v389_v50 = vsub.f32 %v327_v17, %v1991_v36  ;;  %v601_v42 = vmax.f32 %v569_v61, 0.0  ;;  %v443_v56 = vsub.f32 1.0, %v411_v27  ;;  %v335_v27 = vpop.permute.xlu0 %334 }
  0xe6   :  { %v516_v5 = vsub.f32 %v327_v17, %v1978_v28  ;;  %v517_v38 = vsub.f32 %v327_v17, %v1980_v29  ;;  %v571_v59 = vsub.f32 1.0, %v539_v37  ;;  %v541_v39 = vand.u32 2147483647, %v509_v57 }
  0xe7   :  { %v825_v48 = vmul.f32 %v473_v9, %v2019_v26  ;;  %v382_v2 = vsub.f32 %v315_v40, %v1989_v35  ;;  %v1243_v41 = vmul.f32 %v2007_v11, %v601_v42  ;;  %v475_v8 = vmax.f32 %v443_v56, 0.0 }
  0xe8   :  { %v2324_v14 = vand.u32 2147483647, %v388_v10  ;;  %v383_v25 = vsub.f32 %v315_v40, %v1991_v36  ;;  %v510_v61 = vsub.f32 %v315_v40, %v1978_v28  ;;  %v603_v0 = vmax.f32 %v571_v59, 0.0 }
  0xe9   :  { %1161 = vmatprep.mubr.f32.mxu1 %v825_v48  ;;  %v2328_v55 = vand.u32 2147483647, %v389_v50  ;;  %1370 = vmatprep.mubr.f32.mxu0 %v1243_v41  ;;  %v827_v26 = vmul.f32 %v475_v8, %v2056_v19  ;;  %v442_v37 = vsub.f32 1.0, %v2291_v54  ;;  %v570_v17 = vsub.f32 1.0, %v538_v31  ;;  %v323_v31 = vpop.permute.xlu1 %322 }
  0xea   :  { %1162 = vmatmul.mubr.f32.vlgmr.msra.gmra.mxu1 %v824_v60  ;;  %v2332_v11 = vand.u32 2147483647, %v516_v5  ;;  %v2334_v42 = vand.u32 2147483647, %v517_v38  ;;  %v511_v57 = vsub.f32 %v315_v40, %v1980_v29  ;;  %1371 = vmatmul.mubr.f32.vlgmr.msra.gmra.mxu0 %v1242_v47  ;;  %v1245_v10 = vmul.f32 %v2045_v49, %v603_v0 }
  0xeb   :  { %v2338_v9 = vand.u32 2147483647, %v382_v2  ;;  %v392_v50 = vsub.f32 %v335_v27, %v1989_v35  ;;  %1166 = vmatprep.mubr.f32.mxu1 %v827_v26  ;;  %v474_v60 = vmax.f32 %v442_v37, 0.0  ;;  %v602_v56 = vmax.f32 %v570_v17, 0.0  ;;  %v343_v2 = vpop.permute.xlu0 %342 }
  0xec   :  { %v415_v19 = vand.u32 2147483647, %v383_v25  ;;  %v2341_v8 = vand.u32 2147483647, %v510_v61  ;;  %1375 = vmatprep.mubr.f32.mxu0 %v1245_v10  ;;  %v445_v54 = vsub.f32 1.0, %v413_v43  ;;  %v573_v5 = vsub.f32 1.0, %v541_v39 }
  0xed   :  { %v393_v38 = vsub.f32 %v335_v27, %v1991_v36  ;;  %v520_v40 = vsub.f32 %v335_v27, %v1978_v28  ;;  %v826_v49 = vmul.f32 %v474_v60, %v2061_v13  ;;  %v1244_v47 = vmul.f32 %v2059_v15, %v602_v56  ;;  %v331_v60 = vpop.permute.xlu1 %330 }
  0xee   :  { %v543_v48 = vand.u32 2147483647, %v511_v57  ;;  %v521_v59 = vsub.f32 %v335_v27, %v1980_v29  ;;  %v477_v41 = vmax.f32 %v445_v54, 0.0  ;;  %v605_v25 = vmax.f32 %v573_v5, 0.0 }
  0xef   :  { %v2348_v61 = vand.u32 2147483647, %v392_v50  ;;  %v386_v0 = vsub.f32 %v323_v31, %v1989_v35  ;;  %v387_v43 = vsub.f32 %v323_v31, %v1991_v36  ;;  %1167 = vmatmul.mubr.f32.gmra.mxu1 %v826_v49  ;;  %1376 = vmatmul.mubr.f32.gmra.mxu0 %v1244_v47  ;;  %v444_v39 = vsub.f32 1.0, %v2311_v7 }
  0xf0   :  { %v514_v13 = vsub.f32 %v323_v31, %v1978_v28  ;;  %v829_v15 = vmul.f32 %v477_v41, %v2094_v33  ;;  %v1247_v26 = vmul.f32 %v2082_v4, %v605_v25  ;;  %v572_v27 = vsub.f32 1.0, %v2314_v44  ;;  %v351_v25 = vpop.permute.xlu0 %350 }
  0xf1   :  { %v2357_v37 = vand.u32 2147483647, %v393_v38  ;;  %v2359_v17 = vand.u32 2147483647, %v520_v40  ;;  %v515_v57 = vsub.f32 %v323_v31, %v1980_v29  ;;  %v396_v10 = vsub.f32 %v343_v2, %v1989_v35 }
  0xf2   :  { %v2363_v50 = vand.u32 2147483647, %v521_v59  ;;  %v397_v7 = vsub.f32 %v343_v2, %v1991_v36  ;;  %1171 = vmatprep.mubr.f32.mxu1 %v829_v15  ;;  %1380 = vmatprep.mubr.f32.mxu0 %v1247_v26  ;;  %v476_v33 = vmax.f32 %v444_v39, 0.0  ;;  %v604_v56 = vmax.f32 %v572_v27, 0.0 }
  0xf3   :  { %v2366_v4 = vand.u32 2147483647, %v386_v0  ;;  %v2368_v44 = vand.u32 2147483647, %v387_v43  ;;  %v524_v54 = vsub.f32 %v343_v2, %v1978_v28  ;;  %v447_v5 = vsub.f32 1.0, %v415_v19 }
  0xf4   :  { %v2371_v38 = vand.u32 2147483647, %v514_v13  ;;  %v828_v31 = vmul.f32 %v476_v33, %v2092_v32  ;;  %v1246_v40 = vmul.f32 %v2080_v3, %v604_v56  ;;  %v575_v49 = vsub.f32 1.0, %v543_v48 }
  0xf5   :  { %v2375_v47 = vand.u32 2147483647, %v515_v57  ;;  %v2377_v59 = vand.u32 2147483647, %v396_v10  ;;  %v525_v41 = vsub.f32 %v343_v2, %v1980_v29  ;;  %v479_v0 = vmax.f32 %v447_v5, 0.0  ;;  %v339_v57 = vpop.permute.xlu1 %338 }
  0xf6   :  { %v2380_v43 = vand.u32 2147483647, %v397_v7  ;;  %v390_v39 = vsub.f32 %v331_v60, %v1989_v35  ;;  %v391_v19 = vsub.f32 %v331_v60, %v1991_v36  ;;  %1172 = vmatmul.mubr.f32.gmra.mxu1 %v828_v31  ;;  %1381 = vmatmul.mubr.f32.gmra.mxu0 %v1246_v40  ;;  %v607_v32 = vmax.f32 %v575_v49, 0.0 }
  0xf7   :  { %v2384_v13 = vand.u32 2147483647, %v524_v54  ;;  %v831_v3 = vmul.f32 %v479_v0, %v2134_v62  ;;  %v446_v48 = vsub.f32 1.0, %v2338_v9  ;;  %v574_v15 = vsub.f32 1.0, %v2341_v8 }
  0xf8   :  { %v518_v2 = vsub.f32 %v331_v60, %v1978_v28  ;;  %v519_v26 = vsub.f32 %v331_v60, %v1980_v29  ;;  %v400_v27 = vsub.f32 %v351_v25, %v1989_v35  ;;  %v1249_v10 = vmul.f32 %v2121_v34, %v607_v32  ;;  %v359_v32 = vpop.permute.xlu0 %358 }
  0xf9   :  { %v2393_v7 = vand.u32 2147483647, %v525_v41  ;;  %v401_v33 = vsub.f32 %v351_v25, %v1991_v36  ;;  %1176 = vmatprep.mubr.f32.mxu1 %v831_v3  ;;  %v478_v56 = vmax.f32 %v446_v48, 0.0  ;;  %v606_v62 = vmax.f32 %v574_v15, 0.0  ;;  %v347_v15 = vpop.permute.xlu1 %346 }
  0xfa   :  { %v2396_v54 = vand.u32 2147483647, %v390_v39  ;;  %v2398_v9 = vand.u32 2147483647, %v391_v19  ;;  %v528_v8 = vsub.f32 %v351_v25, %v1978_v28  ;;  %v529_v60 = vsub.f32 %v351_v25, %v1980_v29  ;;  %1385 = vmatprep.mubr.f32.mxu0 %v1249_v10 }
  0xfb   :  { %v394_v5 = vsub.f32 %v339_v57, %v1989_v35  ;;  %v395_v34 = vsub.f32 %v339_v57, %v1991_v36  ;;  %v830_v31 = vmul.f32 %v478_v56, %v2125_v46  ;;  %v1248_v40 = vmul.f32 %v2119_v30, %v606_v62 }
  0xfc   :  { %v2406_v49 = vand.u32 2147483647, %v518_v2  ;;  %v2408_v41 = vand.u32 2147483647, %v519_v26  ;;  %v2410_v0 = vand.u32 2147483647, %v400_v27  ;;  %v522_v39 = vsub.f32 %v339_v57, %v1978_v28 }
  0xfd   :  { %v2413_v19 = vand.u32 2147483647, %v401_v33  ;;  %v523_v25 = vsub.f32 %v339_v57, %v1980_v29  ;;  %1177 = vmatmul.mubr.f32.gmra.mxu1 %v830_v31  ;;  %1386 = vmatmul.mubr.f32.gmra.mxu0 %v1248_v40  ;;  %v449_v3 = vsub.f32 1.0, %v2304_v53  ;;  %v577_v46 = vsub.f32 1.0, %v2308_v21 }
  0xfe   :  { %v2418_v30 = vand.u32 2147483647, %v528_v8  ;;  %v2420_v48 = vand.u32 2147483647, %v529_v60  ;;  %v448_v2 = vsub.f32 1.0, %v2302_v51  ;;  %v576_v26 = vsub.f32 1.0, %v2306_v12 }
  0xff   :  { %v2424_v27 = vand.u32 2147483647, %v394_v5  ;;  %v2426_v10 = vand.u32 2147483647, %v395_v34  ;;  %v481_v57 = vmax.f32 %v449_v3, 0.0  ;;  %v609_v33 = vmax.f32 %v577_v46, 0.0 }
 0x100   :  { %v2428_v56 = vand.u32 2147483647, %v522_v39  ;;  %v404_v53 = vsub.f32 %v359_v32, %v1989_v35  ;;  %v480_v21 = vmax.f32 %v448_v2, 0.0  ;;  %v608_v62 = vmax.f32 %v576_v26, 0.0 }
 0x101   :  { %v2431_v8 = vand.u32 2147483647, %v523_v25  ;;  %v405_v60 = vsub.f32 %v359_v32, %v1991_v36  ;;  %v833_v51 = vmul.f32 %v481_v57, %v2177_v1  ;;  %v1251_v12 = vmul.f32 %v2166_v22, %v609_v33 }
 0x102   :  { %v832_v5 = vmul.f32 %v480_v21, %v2171_v18  ;;  %v1250_v34 = vmul.f32 %v2164_v23, %v608_v62  ;;  %v451_v31 = vsub.f32 1.0, %v2368_v44  ;;  %v579_v40 = vsub.f32 1.0, %v2375_v47  ;;  %v2447_v23 = vpop.permute.xlu1 %354 }
 0x103   :  { %v532_v39 = vsub.f32 %v359_v32, %v1978_v28  ;;  %v533_v3 = vsub.f32 %v359_v32, %v1980_v29  ;;  %1181 = vmatprep.mubr.f32.mxu1 %v833_v51  ;;  %1390 = vmatprep.mubr.f32.mxu0 %v1251_v12  ;;  %v450_v25 = vsub.f32 1.0, %v2366_v4  ;;  %v578_v1 = vsub.f32 1.0, %v2371_v38 }
 0x104   :  { %v2444_v46 = vand.u32 2147483647, %v404_v53  ;;  %v398_v22 = vsub.f32 %v347_v15, %v1989_v35  ;;  %1182 = vmatmul.mubr.f32.gmra.mxu1 %v832_v5  ;;  %1391 = vmatmul.mubr.f32.gmra.mxu0 %v1250_v34  ;;  %v483_v18 = vmax.f32 %v451_v31, 0.0  ;;  %v611_v44 = vmax.f32 %v579_v40, 0.0 }
 0x105   :  { %v2449_v47 = vand.u32 2147483647, %v405_v60  ;;  %v399_v32 = vsub.f32 %v347_v15, %v1991_v36  ;;  %v482_v2 = vmax.f32 %v450_v25, 0.0  ;;  %v610_v26 = vmax.f32 %v578_v1, 0.0 }
 0x106   :  { %v526_v4 = vsub.f32 %v347_v15, %v1978_v28  ;;  %v527_v38 = vsub.f32 %v347_v15, %v1980_v29  ;;  %v835_v57 = vmul.f32 %v483_v18, %v2213_v58  ;;  %v1253_v33 = vmul.f32 %v2207_v20, %v611_v44 }
 0x107   :  { %v2456_v53 = vand.u32 2147483647, %v532_v39  ;;  %v403_v21 = vsub.f32 %v2447_v23, %v1991_v36  ;;  %v834_v62 = vmul.f32 %v482_v2, %v2222_v63  ;;  %v1252_v60 = vmul.f32 %v2220_v24, %v610_v26 }
 0x108   :  { %v2462_v51 = vand.u32 2147483647, %v533_v3  ;;  %v2464_v12 = vand.u32 2147483647, %v398_v22  ;;  %1186 = vmatprep.mubr.f32.mxu1 %v835_v57  ;;  %1395 = vmatprep.mubr.f32.mxu0 %v1253_v33  ;;  %v453_v15 = vsub.f32 1.0, %v2328_v55  ;;  %v581_v58 = vsub.f32 1.0, %v2334_v42 }
 0x109   :  { %v2468_v20 = vand.u32 2147483647, %v399_v32  ;;  %v402_v5 = vsub.f32 %v2447_v23, %v1989_v35  ;;  %1187 = vmatmul.mubr.f32.gmra.mxu1 %v834_v62  ;;  %1396 = vmatmul.mubr.f32.gmra.mxu0 %v1252_v60  ;;  %v452_v63 = vsub.f32 1.0, %v2324_v14  ;;  %v580_v24 = vsub.f32 1.0, %v2332_v11  ;;  %v2680_v57 = vld [vmem:[#allocation40_spill] sm:$0xff]  ;;  %v2681_v62 = vld [vmem:[#allocation43_spill] sm:$0xff] }
 0x10a   :  { %v2474_v34 = vand.u32 2147483647, %v526_v4  ;;  %v2476_v31 = vand.u32 2147483647, %v527_v38  ;;  %v485_v40 = vmax.f32 %v453_v15, 0.0  ;;  %v613_v39 = vmax.f32 %v581_v58, 0.0 }
 0x10b   :  { %v2478_v55 = vand.u32 2147483647, %v403_v21  ;;  %v531_v42 = vsub.f32 %v2447_v23, %v1980_v29  ;;  %v484_v3 = vmax.f32 %v452_v63, 0.0  ;;  %v612_v25 = vmax.f32 %v580_v24, 0.0  ;;  %v2679_v38 = vld [vmem:[#allocation41_spill] sm:$0xff]  ;;  %v2682_v15 = vld [vmem:[#allocation42_spill] sm:$0xff] }
 0x10c   :  { %v837_v1 = vmul.f32 %v485_v40, %v2243_v45  ;;  %v1255_v22 = vmul.f32 %v2240_v6, %v613_v39  ;;  %v455_v14 = vsub.f32 1.0, %v2398_v9  ;;  %v583_v11 = vsub.f32 1.0, %v2408_v41  ;;  %v2683_v63 = vld [vmem:[#allocation9_spill] sm:$0xff]  ;;  %v2684_v40 = vld [vmem:[#allocation11_spill] sm:$0xff] }
 0x10d   :  { %v836_v18 = vmul.f32 %v484_v3, %v2248_v52  ;;  %v1254_v44 = vmul.f32 %v2246_v16, %v612_v25  ;;  %v454_v32 = vsub.f32 1.0, %v2396_v54  ;;  %v582_v2 = vsub.f32 1.0, %v2406_v49  ;;  %v2685_v3 = vld [vmem:[#allocation8_spill] sm:$0xff] }
 0x10e   :  { %1191 = vmatprep.mubr.f32.mxu1 %v837_v1  ;;  %1400 = vmatprep.mubr.f32.mxu0 %v1255_v22  ;;  %v487_v26 = vmax.f32 %v455_v14, 0.0  ;;  %v615_v4 = vmax.f32 %v583_v11, 0.0  ;;  %v457_v45 = vsub.f32 1.0, %v2357_v37  ;;  %v585_v6 = vsub.f32 1.0, %v2363_v50  ;;  %v2686_v1 = vld [vmem:[#allocation10_spill] sm:$0xff] }
 0x10f   :  { %1192 = vmatmul.mubr.f32.gmra.mxu1 %v836_v18  ;;  %1401 = vmatmul.mubr.f32.gmra.mxu0 %v1254_v44  ;;  %v486_v9 = vmax.f32 %v454_v32, 0.0  ;;  %v614_v41 = vmax.f32 %v582_v2, 0.0  ;;  %v456_v52 = vsub.f32 1.0, %v2348_v61  ;;  %v584_v16 = vsub.f32 1.0, %v2359_v17 }
 0x110   :  { %v839_v54 = vmul.f32 %v487_v26, %v2679_v38  ;;  %v1257_v49 = vmul.f32 %v2680_v57, %v615_v4  ;;  %v489_v33 = vmax.f32 %v457_v45, 0.0  ;;  %v617_v21 = vmax.f32 %v585_v6, 0.0  ;;  %v2687_v45 = vld [vmem:[#allocation15_spill] sm:$0xff]  ;;  %v2690_v38 = vld [vmem:[#allocation12_spill] sm:$0xff]  ;;  %v363_v57 = vpop.permute.xlu1 %362 }
 0x111   :  { %v838_v60 = vmul.f32 %v486_v9, %v2681_v62  ;;  %v1256_v37 = vmul.f32 %v2682_v15, %v614_v41  ;;  %v488_v58 = vmax.f32 %v456_v52, 0.0  ;;  %v616_v50 = vmax.f32 %v584_v16, 0.0  ;;  %v2688_v9 = vld [vmem:[#allocation13_spill] sm:$0xff] }
 0x112   :  { %1196 = vmatprep.mubr.f32.mxu1 %v839_v54  ;;  %1405 = vmatprep.mubr.f32.mxu0 %v1257_v49  ;;  %v841_v24 = vmul.f32 %v489_v33, %v2683_v63  ;;  %v1259_v61 = vmul.f32 %v2684_v40, %v617_v21  ;;  %v459_v17 = vsub.f32 1.0, %v2426_v10  ;;  %v587_v39 = vsub.f32 1.0, %v2431_v8  ;;  %v2691_v21 = vld [vmem:[#allocation18_spill] sm:$0xff] }
 0x113   :  { %1197 = vmatmul.mubr.f32.gmra.mxu1 %v838_v60  ;;  %1406 = vmatmul.mubr.f32.gmra.mxu0 %v1256_v37  ;;  %v840_v25 = vmul.f32 %v488_v58, %v2685_v3  ;;  %v1258_v22 = vmul.f32 %v2686_v1, %v616_v50  ;;  %v458_v14 = vsub.f32 1.0, %v2424_v27  ;;  %v586_v11 = vsub.f32 1.0, %v2428_v56  ;;  %v2692_v60 = vld [vmem:[#allocation17_spill] sm:$0xff] }
 0x114   :  { %1201 = vmatprep.mubr.f32.mxu1 %v841_v24  ;;  %1410 = vmatprep.mubr.f32.mxu0 %v1259_v61  ;;  %v491_v18 = vmax.f32 %v459_v17, 0.0  ;;  %v619_v44 = vmax.f32 %v587_v39, 0.0  ;;  %v461_v32 = vsub.f32 1.0, %v2380_v43  ;;  %v589_v10 = vsub.f32 1.0, %v2393_v7  ;;  %v2689_v43 = vld [vmem:[#allocation14_spill] sm:$0xff]  ;;  %v2694_v17 = vld [vmem:[#allocation16_spill] sm:$0xff] }
 0x115   :  { %v490_v2 = vmax.f32 %v458_v14, 0.0  ;;  %v618_v8 = vmax.f32 %v586_v11, 0.0  ;;  %v460_v26 = vsub.f32 1.0, %v2377_v59  ;;  %v588_v4 = vsub.f32 1.0, %v2384_v13  ;;  %v2696_v1 = vld [vmem:[#allocation21_spill] sm:$0xff] }
 0x116   :  { %v843_v6 = vmul.f32 %v491_v18, %v2687_v45  ;;  %v1261_v27 = vmul.f32 %v2688_v9, %v619_v44  ;;  %v493_v41 = vmax.f32 %v461_v32, 0.0  ;;  %v621_v56 = vmax.f32 %v589_v10, 0.0  ;;  %v2699_v9 = vld [vmem:[#allocation26_spill] sm:$0xff] }
 0x117   :  { %v530_v52 = vsub.f32 %v2447_v23, %v1978_v28  ;;  %v563_v16 = vand.u32 2147483647, %v531_v42  ;;  %1202 = vmatmul.mubr.f32.gmra.mxu1 %v840_v25  ;;  %1411 = vmatmul.mubr.f32.gmra.mxu0 %v1258_v22  ;;  %v842_v7 = vmul.f32 %v490_v2, %v2689_v43  ;;  %v1260_v54 = vmul.f32 %v2690_v38, %v618_v8 }
 0x118   :  { %1206 = vmatprep.mubr.f32.mxu1 %v843_v6  ;;  %1415 = vmatprep.mubr.f32.mxu0 %v1261_v27  ;;  %v492_v59 = vmax.f32 %v460_v26, 0.0  ;;  %v620_v13 = vmax.f32 %v588_v4, 0.0  ;;  %v463_v49 = vsub.f32 1.0, %v2468_v20  ;;  %v591_v33 = vsub.f32 1.0, %v2476_v31  ;;  %v2698_v26 = vld [vmem:[#allocation20_spill] sm:$0xff]  ;;  %v2700_v27 = vld [vmem:[#allocation25_spill] sm:$0xff] }
 0x119   :  { %v845_v62 = vmul.f32 %v493_v41, %v2691_v21  ;;  %v1263_v15 = vmul.f32 %v2692_v60, %v621_v56  ;;  %v462_v42 = vsub.f32 1.0, %v2464_v12  ;;  %v590_v37 = vsub.f32 1.0, %v2474_v34  ;;  %v2693_v12 = vld [vmem:[#allocation19_spill] sm:$0xff]  ;;  %v2703_v60 = vld [vmem:[#allocation30_spill] sm:$0xff] }
 0x11a   :  { %v495_v58 = vmax.f32 %v463_v49, 0.0  ;;  %v623_v50 = vmax.f32 %v591_v33, 0.0  ;;  %v465_v63 = vsub.f32 1.0, %v2413_v19  ;;  %v593_v24 = vsub.f32 1.0, %v2420_v48  ;;  %v2695_v48 = vld [vmem:[#allocation22_spill] sm:$0xff] }
 0x11b   :  { %v434_v20 = vand.u32 2147483647, %v402_v5  ;;  %v562_v40 = vand.u32 2147483647, %v530_v52  ;;  %v407_v31 = vsub.f32 %v363_v57, %v1991_v36  ;;  %v535_v61 = vsub.f32 %v363_v57, %v1980_v29  ;;  %1207 = vmatmul.mubr.f32.gmra.mxu1 %v842_v7  ;;  %1416 = vmatmul.mubr.f32.gmra.mxu0 %v1260_v54  ;;  %v2701_v54 = vld [vmem:[#allocation27_spill] sm:$0xff] }
 0x11c   :  { %1211 = vmatprep.mubr.f32.mxu1 %v845_v62  ;;  %1420 = vmatprep.mubr.f32.mxu0 %v1263_v15  ;;  %v844_v34 = vmul.f32 %v492_v59, %v2693_v12  ;;  %v1262_v39 = vmul.f32 %v2694_v17, %v620_v13  ;;  %v494_v19 = vmax.f32 %v462_v42, 0.0  ;;  %v622_v3 = vmax.f32 %v590_v37, 0.0  ;;  %v2702_v59 = vld [vmem:[#allocation24_spill] sm:$0xff]  ;;  %v2704_v15 = vld [vmem:[#allocation29_spill] sm:$0xff]  ;;  %v2707_v12 = vld [vmem:[#allocation35_spill] sm:$0xff] }
 0x11d   :  { %v847_v25 = vmul.f32 %v495_v58, %v2695_v48  ;;  %v1265_v23 = vmul.f32 %v2696_v1, %v623_v50  ;;  %v464_v5 = vsub.f32 1.0, %v2410_v0  ;;  %v592_v36 = vsub.f32 1.0, %v2418_v30  ;;  %v2697_v0 = vld [vmem:[#allocation23_spill] sm:$0xff]  ;;  %v2708_v17 = vld [vmem:[#allocation33_spill] sm:$0xff]  ;;  %v2709_v48 = vld [vmem:[#allocation34_spill] sm:$0xff] }
 0x11e   :  { %v497_v22 = vmax.f32 %v465_v63, 0.0  ;;  %v625_v29 = vmax.f32 %v593_v24, 0.0  ;;  %v467_v14 = vsub.f32 1.0, %v2478_v55  ;;  %v595_v11 = vsub.f32 1.0, %v563_v16  ;;  %v2705_v63 = vld [vmem:[#allocation31_spill] sm:$0xff]  ;;  %v2710_v1 = vld [vmem:[#allocation32_spill] sm:$0xff] }
 0x11f   :  { %v469_v18 = vsub.f32 1.0, %v2449_v47  ;;  %v597_v44 = vsub.f32 1.0, %v2462_v51  ;;  %v406_v32 = vsub.f32 %v363_v57, %v1989_v35  ;;  %v534_v10 = vsub.f32 %v363_v57, %v1978_v28  ;;  %1212 = vmatmul.mubr.f32.gmra.mxu1 %v844_v34  ;;  %1421 = vmatmul.mubr.f32.gmra.mxu0 %v1262_v39 }
 0x120   :  { %v439_v2 = vand.u32 2147483647, %v407_v31  ;;  %v567_v8 = vand.u32 2147483647, %v535_v61  ;;  %1216 = vmatprep.mubr.f32.mxu1 %v847_v25  ;;  %1425 = vmatprep.mubr.f32.mxu0 %v1265_v23  ;;  %v846_v30 = vmul.f32 %v494_v19, %v2697_v0  ;;  %v1264_v4 = vmul.f32 %v2698_v26, %v622_v3 }
 0x121   :  { %v496_v55 = vmax.f32 %v464_v5, 0.0  ;;  %v624_v45 = vmax.f32 %v592_v36, 0.0  ;;  %v466_v6 = vsub.f32 1.0, %v434_v20  ;;  %v594_v47 = vsub.f32 1.0, %v562_v40  ;;  %v2706_v20 = vld [vmem:[#allocation28_spill] sm:$0xff]  ;;  %v2711_v5 = vld [vmem:[#allocation37_spill] sm:$0xff] }
 0x122   :  { %v849_v51 = vmul.f32 %v497_v22, %v2699_v9  ;;  %v1267_v35 = vmul.f32 %v2700_v27, %v625_v29  ;;  %v499_v41 = vmax.f32 %v467_v14, 0.0  ;;  %v627_v28 = vmax.f32 %v595_v11, 0.0  ;;  %v2712_v22 = vld [vmem:[#allocation36_spill] sm:$0xff]  ;;  %v2713_v14 = vld [vmem:[#allocation39_spill] sm:$0xff] }
 0x123   :  { %v468_v56 = vsub.f32 1.0, %v2444_v46  ;;  %v596_v52 = vsub.f32 1.0, %v2456_v53  ;;  %1217 = vmatmul.mubr.f32.gmra.mxu1 %v846_v30  ;;  %1426 = vmatmul.mubr.f32.gmra.mxu0 %v1264_v4  ;;  %v501_v16 = vmax.f32 %v469_v18, 0.0  ;;  %v629_v43 = vmax.f32 %v597_v44, 0.0  ;;  %v2714_v18 = vld [vmem:[#allocation38_spill] sm:$0xff] }
 0x124   :  { %v438_v7 = vand.u32 2147483647, %v406_v32  ;;  %v566_v38 = vand.u32 2147483647, %v534_v10  ;;  %1221 = vmatprep.mubr.f32.mxu1 %v849_v51  ;;  %1430 = vmatprep.mubr.f32.mxu0 %v1267_v35  ;;  %v848_v57 = vmul.f32 %v496_v55, %v2701_v54  ;;  %v1266_v13 = vmul.f32 %v2702_v59, %v624_v45 }
 0x125   :  { %v498_v49 = vmax.f32 %v466_v6, 0.0  ;;  %v626_v33 = vmax.f32 %v594_v47, 0.0  ;;  %v471_v21 = vsub.f32 1.0, %v439_v2  ;;  %v599_v62 = vsub.f32 1.0, %v567_v8 }
 0x126   :  { %v851_v46 = vmul.f32 %v499_v41, %v2703_v60  ;;  %v1269_v53 = vmul.f32 %v2704_v15, %v627_v28  ;;  %v500_v42 = vmax.f32 %v468_v56, 0.0  ;;  %v628_v37 = vmax.f32 %v596_v52, 0.0 }
 0x127   :  { %1222 = vmatmul.mubr.f32.gmra.mxu1 %v848_v57  ;;  %1431 = vmatmul.mubr.f32.gmra.mxu0 %v1266_v13  ;;  %v470_v58 = vsub.f32 1.0, %v438_v7  ;;  %v598_v50 = vsub.f32 1.0, %v566_v38  ;;  %v850_v24 = vmul.f32 %v498_v49, %v2705_v63  ;;  %v1268_v40 = vmul.f32 %v2706_v20, %v626_v33 }
 0x128   :  { %1226 = vmatprep.mubr.f32.mxu1 %v851_v46  ;;  %1435 = vmatprep.mubr.f32.mxu0 %v1269_v53  ;;  %v503_v31 = vmax.f32 %v471_v21, 0.0  ;;  %v631_v61 = vmax.f32 %v599_v62, 0.0  ;;  %v853_v34 = vmul.f32 %v501_v16, %v2707_v12  ;;  %v1271_v39 = vmul.f32 %v2708_v17, %v629_v43 }
 0x129   :  { %v502_v19 = vmax.f32 %v470_v58, 0.0  ;;  %v630_v3 = vmax.f32 %v598_v50, 0.0  ;;  %v852_v25 = vmul.f32 %v500_v42, %v2709_v48  ;;  %v1270_v23 = vmul.f32 %v2710_v1, %v628_v37 }
 0x12a   :  { %v855_v36 = vmul.f32 %v503_v31, %v2711_v5  ;;  %v1273_v29 = vmul.f32 %v2712_v22, %v631_v61 }
 0x12b   :  { %1227 = vmatmul.mubr.f32.gmra.mxu1 %v850_v24  ;;  %1436 = vmatmul.mubr.f32.gmra.mxu0 %v1268_v40  ;;  %v854_v11 = vmul.f32 %v502_v19, %v2713_v14  ;;  %v1272_v44 = vmul.f32 %v2714_v18, %v630_v3 }
 0x12c   :  { %1231 = vmatprep.mubr.f32.mxu1 %v853_v34  ;;  %1440 = vmatprep.mubr.f32.mxu0 %v1271_v39 }
 0x12f   :  { %1232 = vmatmul.mubr.f32.gmra.mxu1 %v852_v25  ;;  %1441 = vmatmul.mubr.f32.gmra.mxu0 %v1270_v23 }
 0x130   :  { %1236 = vmatprep.mubr.f32.mxu1 %v855_v36  ;;  %1445 = vmatprep.mubr.f32.mxu0 %v1273_v29 }
 0x133   :  { %1237 = vmatmul.mubr.f32.gmra.mxu1 %v854_v11  ;;  %1446 = vmatmul.mubr.f32.gmra.mxu0 %v1272_v44 }
 0x163   :  { %v1556_v32 = vpop.f32.mrf.mxu1 }
 0x164   :  { %v1532_v47 = vpop.f32.mrf.mxu0 }
 0x165   :  { %v1557_v10 = vpop.f32.mrf.mxu1 }
 0x166   :  { %v2560_v2 = vadd.f32 %v1557_v10, %v1556_v32  ;;  %v1533_v51 = vpop.f32.mrf.mxu0 }
 0x167   :  { %v1534_v40 = vadd.f32 %v1533_v51, %v1532_v47 }
 0x168   :  { %v1559_v8 = vpop.f32.mrf.mxu1 }
 0x16a   :  { %v1560_v0 = vpop.f32.mrf.mxu1 }
 0x16b   :  { %v2562_v30 = vadd.f32 %v1560_v0, %v1559_v8 }
 0x16e   :  { %v1535_v27 = vpop.f32.mrf.mxu0 }
 0x170   :  { %v1536_v56 = vpop.f32.mrf.mxu0 }
 0x171   :  { %v1562_v26 = vpop.f32.mrf.mxu1  ;;  %v1537_v25 = vadd.f32 %v1536_v56, %v1535_v27 }
 0x173   :  { %v1563_v4 = vpop.f32.mrf.mxu1 }
 0x174   :  { %v2564_v55 = vadd.f32 %v1563_v4, %v1562_v26 }
 0x177   :  { %v1538_v52 = vpop.f32.mrf.mxu0 }
 0x179   :  { %v1539_v43 = vpop.f32.mrf.mxu0 }
 0x17a   :  { %v1540_v18 = vadd.f32 %v1539_v43, %v1538_v52 }
 0x17b   :  { %v1565_v45 = vpop.f32.mrf.mxu1 }
 0x17d   :  { %v1566_v6 = vpop.f32.mrf.mxu1 }
 0x17e   :  { %v2566_v9 = vadd.f32 %v1566_v6, %v1565_v45 }
 0x181   :  { %v1541_v38 = vpop.f32.mrf.mxu0 }
 0x183   :  { %v1542_v57 = vpop.f32.mrf.mxu0 }
 0x184   :  { %v1543_v6 = vadd.f32 %v1542_v57, %v1541_v38 }
 0x185   :  { %v1568_v35 = vpop.f32.mrf.mxu1 }
 0x187   :  { %v1569_v41 = vpop.f32.mrf.mxu1 }
 0x188   :  { %v2568_v28 = vadd.f32 %v1569_v41, %v1568_v35 }
 0x18a   :  { %v1544_v59 = vpop.f32.mrf.mxu0 }
 0x18c   :  { %v1545_v21 = vpop.f32.mrf.mxu0 }
 0x18d   :  { %v1571_v16 = vpop.f32.mrf.mxu1  ;;  %v1546_v52 = vadd.f32 %v1545_v21, %v1544_v59 }
 0x18f   :  { %v1572_v7 = vpop.f32.mrf.mxu1 }
 0x190   :  { %v2570_v54 = vadd.f32 %v1572_v7, %v1571_v16 }
 0x192   :  { %v1547_v62 = vpop.f32.mrf.mxu0 }
 0x194   :  { %v1548_v60 = vpop.f32.mrf.mxu0 }
 0x196   :  { %v1574_v13 = vpop.f32.mrf.mxu1 }
 0x198   :  { %v1575_v49 = vpop.f32.mrf.mxu1 }
 0x199   :  { %v2572_v33 = vadd.f32 %v1575_v49, %v1574_v13  ;;  %v2574_v15 = vpop.f32.mrf.mxu0 }
 0x19b   :  { %v2578_v37 = vpop.f32.mrf.mxu0 }
 0x19c   :  { %v1577_v46 = vpop.f32.mrf.mxu1  ;;  %v1552_v59 = vadd.f32 %v2578_v37, %v2574_v15 }
 0x19e   :  { %v1578_v53 = vpop.f32.mrf.mxu1 }
 0x19f   :  { %v2576_v42 = vadd.f32 %v1578_v53, %v1577_v46 }
 0x1a1   :  { %v2580_v58 = vpop.f32.mrf.mxu0 }
 0x1a3   :  { %v2582_v50 = vpop.f32.mrf.mxu0 }
 0x1aa   :  { %v1612_v63 = vpop.f32.mrf.mxu1  ;;  %v1692_v24 = vpop.f32.mrf.mxu0 }
 0x1ac   :  { %v1613_v20 = vpop.f32.mrf.mxu1  ;;  %v1693_v61 = vpop.f32.mrf.mxu0 }
 0x1ad   :  { %v1614_v31 = vadd.f32 %v1613_v20, %v1612_v63  ;;  %v1694_v34 = vadd.f32 %v1693_v61, %v1692_v24 }
 0x1af   :  { %v1164_v12 = vadd.f32 %v1614_v31, %v1534_v40  ;;  %v1615_v17 = vpop.f32.mrf.mxu1  ;;  %v1695_v39 = vpop.f32.mrf.mxu0  ;;  %v1549_v40 = vadd.f32 %v1548_v60, %v1547_v62  ;;  %v1555_v60 = vadd.f32 %v2582_v50, %v2580_v58 }
 0x1b1   :  { %v1451_v19 = vadd.f32 %v1694_v34, %v1164_v12  ;;  %v1616_v3 = vpop.f32.mrf.mxu1  ;;  %v1696_v48 = vpop.f32.mrf.mxu0 }
 0x1b2   :  { %v1617_v1 = vadd.f32 %v1616_v3, %v1615_v17  ;;  %v1697_v5 = vadd.f32 %v1696_v48, %v1695_v39 }
 0x1b3   :  { %1467 = vst [vmem:[#allocation5] sm:$0xff] %v1451_v19 }
 0x1b4   :  { %v1169_v23 = vadd.f32 %v1617_v1, %v1537_v25 }
 0x1b6   :  { %v1452_v36 = vadd.f32 %v1697_v5, %v1169_v23  ;;  %v1618_v22 = vpop.f32.mrf.mxu1  ;;  %v1698_v29 = vpop.f32.mrf.mxu0 }
 0x1b8   :  { %1468 = vst [vmem:[#allocation5 + $0x8] sm:$0xff] %v1452_v36  ;;  %v1619_v14 = vpop.f32.mrf.mxu1  ;;  %v1699_v11 = vpop.f32.mrf.mxu0 }
 0x1b9   :  { %v1620_v44 = vadd.f32 %v1619_v14, %v1618_v22  ;;  %v1700_v10 = vadd.f32 %v1699_v11, %v1698_v29 }
 0x1bb   :  { %v1174_v32 = vadd.f32 %v1620_v44, %v1540_v18 }
 0x1bd   :  { %v1453_v8 = vadd.f32 %v1700_v10, %v1174_v32  ;;  %v1621_v0 = vpop.f32.mrf.mxu1  ;;  %v1701_v26 = vpop.f32.mrf.mxu0 }
 0x1bf   :  { %1469 = vst [vmem:[#allocation5 + $0x10] sm:$0xff] %v1453_v8  ;;  %v1622_v4 = vpop.f32.mrf.mxu1  ;;  %v1702_v45 = vpop.f32.mrf.mxu0 }
 0x1c0   :  { %v1623_v47 = vadd.f32 %v1622_v4, %v1621_v0  ;;  %v1703_v27 = vadd.f32 %v1702_v45, %v1701_v26 }
 0x1c2   :  { %v1179_v51 = vadd.f32 %v1623_v47, %v1543_v6 }
 0x1c4   :  { %v1454_v35 = vadd.f32 %v1703_v27, %v1179_v51  ;;  %v1624_v41 = vpop.f32.mrf.mxu1  ;;  %v1704_v56 = vpop.f32.mrf.mxu0 }
 0x1c6   :  { %1470 = vst [vmem:[#allocation5 + $0x18] sm:$0xff] %v1454_v35  ;;  %v1625_v16 = vpop.f32.mrf.mxu1  ;;  %v1705_v7 = vpop.f32.mrf.mxu0 }
 0x1c7   :  { %v1626_v43 = vadd.f32 %v1625_v16, %v1624_v41  ;;  %v1706_v49 = vadd.f32 %v1705_v7, %v1704_v56 }
 0x1c9   :  { %v1184_v13 = vadd.f32 %v1626_v43, %v1546_v52  ;;  %v1627_v46 = vpop.f32.mrf.mxu1  ;;  %v1707_v53 = vpop.f32.mrf.mxu0 }
 0x1cb   :  { %v1455_v63 = vadd.f32 %v1706_v49, %v1184_v13  ;;  %v1628_v24 = vpop.f32.mrf.mxu1  ;;  %v1708_v20 = vpop.f32.mrf.mxu0 }
 0x1cc   :  { %v1629_v38 = vadd.f32 %v1628_v24, %v1627_v46  ;;  %v1709_v31 = vadd.f32 %v1708_v20, %v1707_v53 }
 0x1cd   :  { %1471 = vst [vmem:[#allocation5 + $0x20] sm:$0xff] %v1455_v63 }
 0x1ce   :  { %v1189_v57 = vadd.f32 %v1629_v38, %v1549_v40 }
 0x1cf   :  { %v1630_v61 = vpop.f32.mrf.mxu1  ;;  %v1710_v12 = vpop.f32.mrf.mxu0 }
 0x1d0   :  { %v1456_v34 = vadd.f32 %v1709_v31, %v1189_v57 }
 0x1d1   :  { %v1631_v17 = vpop.f32.mrf.mxu1  ;;  %v1711_v39 = vpop.f32.mrf.mxu0 }
 0x1d2   :  { %1472 = vst [vmem:[#allocation5 + $0x28] sm:$0xff] %v1456_v34  ;;  %v1632_v21 = vadd.f32 %v1631_v17, %v1630_v61  ;;  %v1712_v25 = vadd.f32 %v1711_v39, %v1710_v12 }
 0x1d3   :  { %v1633_v19 = vpop.f32.mrf.mxu1  ;;  %v1713_v3 = vpop.f32.mrf.mxu0 }
 0x1d4   :  { %v1194_v48 = vadd.f32 %v1632_v21, %v1552_v59 }
 0x1d5   :  { %v1634_v1 = vpop.f32.mrf.mxu1  ;;  %v1714_v62 = vpop.f32.mrf.mxu0 }
 0x1d6   :  { %v1457_v23 = vadd.f32 %v1712_v25, %v1194_v48  ;;  %v1635_v5 = vadd.f32 %v1634_v1, %v1633_v19  ;;  %v1715_v14 = vadd.f32 %v1714_v62, %v1713_v3 }
 0x1d7   :  { %v1636_v36 = vpop.f32.mrf.mxu1  ;;  %v1716_v22 = vpop.f32.mrf.mxu0 }
 0x1d8   :  { %1473 = vst [vmem:[#allocation5 + $0x30] sm:$0xff] %v1457_v23  ;;  %v1199_v29 = vadd.f32 %v1635_v5, %v1555_v60 }
 0x1d9   :  { %v1637_v11 = vpop.f32.mrf.mxu1  ;;  %v1717_v15 = vpop.f32.mrf.mxu0 }
 0x1da   :  { %v1458_v37 = vadd.f32 %v1715_v14, %v1199_v29  ;;  %v1638_v18 = vadd.f32 %v1637_v11, %v1636_v36  ;;  %v1718_v8 = vadd.f32 %v1717_v15, %v1716_v22 }
 0x1db   :  { %v1639_v44 = vpop.f32.mrf.mxu1  ;;  %v1719_v32 = vpop.f32.mrf.mxu0 }
 0x1dc   :  { %1474 = vst [vmem:[#allocation5 + $0x38] sm:$0xff] %v1458_v37  ;;  %v1204_v10 = vadd.f32 %v1638_v18, %v2560_v2 }
 0x1dd   :  { %v1640_v0 = vpop.f32.mrf.mxu1  ;;  %v1720_v26 = vpop.f32.mrf.mxu0 }
 0x1de   :  { %v1459_v58 = vadd.f32 %v1718_v8, %v1204_v10  ;;  %v1641_v50 = vadd.f32 %v1640_v0, %v1639_v44  ;;  %v1721_v47 = vadd.f32 %v1720_v26, %v1719_v32 }
 0x1df   :  { %v1642_v4 = vpop.f32.mrf.mxu1  ;;  %v1722_v45 = vpop.f32.mrf.mxu0 }
 0x1e0   :  { %1475 = vst [vmem:[#allocation5 + $0x40] sm:$0xff] %v1459_v58  ;;  %v1209_v6 = vadd.f32 %v1641_v50, %v2562_v30 }
 0x1e1   :  { %v1643_v51 = vpop.f32.mrf.mxu1  ;;  %v1723_v27 = vpop.f32.mrf.mxu0 }
 0x1e2   :  { %v1460_v35 = vadd.f32 %v1721_v47, %v1209_v6  ;;  %v1644_v41 = vadd.f32 %v1643_v51, %v1642_v4  ;;  %v1724_v7 = vadd.f32 %v1723_v27, %v1722_v45 }
 0x1e3   :  { %v1645_v56 = vpop.f32.mrf.mxu1  ;;  %v1725_v16 = vpop.f32.mrf.mxu0 }
 0x1e4   :  { %1476 = vst [vmem:[#allocation5 + $0x48] sm:$0xff] %v1460_v35  ;;  %v1214_v2 = vadd.f32 %v1644_v41, %v2564_v55 }
 0x1e5   :  { %v1646_v52 = vpop.f32.mrf.mxu1  ;;  %v1726_v43 = vpop.f32.mrf.mxu0 }
 0x1e6   :  { %v1461_v13 = vadd.f32 %v1724_v7, %v1214_v2  ;;  %v1647_v49 = vadd.f32 %v1646_v52, %v1645_v56  ;;  %v1727_v63 = vadd.f32 %v1726_v43, %v1725_v16 }
 0x1e7   :  { %v1648_v46 = vpop.f32.mrf.mxu1  ;;  %v1728_v53 = vpop.f32.mrf.mxu0 }
 0x1e8   :  { %1477 = vst [vmem:[#allocation5 + $0x50] sm:$0xff] %v1461_v13  ;;  %v1219_v30 = vadd.f32 %v1647_v49, %v2566_v9 }
 0x1e9   :  { %v1649_v24 = vpop.f32.mrf.mxu1  ;;  %v1729_v20 = vpop.f32.mrf.mxu0 }
 0x1ea   :  { %v1462_v40 = vadd.f32 %v1727_v63, %v1219_v30  ;;  %v1650_v38 = vadd.f32 %v1649_v24, %v1648_v46  ;;  %v1730_v61 = vadd.f32 %v1729_v20, %v1728_v53 }
 0x1eb   :  { %v1651_v57 = vpop.f32.mrf.mxu1  ;;  %v1731_v31 = vpop.f32.mrf.mxu0 }
 0x1ec   :  { %1478 = vst [vmem:[#allocation5 + $0x58] sm:$0xff] %v1462_v40  ;;  %v1224_v55 = vadd.f32 %v1650_v38, %v2568_v28 }
 0x1ed   :  { %v1652_v12 = vpop.f32.mrf.mxu1  ;;  %v1732_v34 = vpop.f32.mrf.mxu0 }
 0x1ee   :  { %v1463_v17 = vadd.f32 %v1730_v61, %v1224_v55  ;;  %v1653_v39 = vadd.f32 %v1652_v12, %v1651_v57  ;;  %v1733_v19 = vadd.f32 %v1732_v34, %v1731_v31 }
 0x1ef   :  { %v1654_v59 = vpop.f32.mrf.mxu1  ;;  %v1734_v21 = vpop.f32.mrf.mxu0 }
 0x1f0   :  { %1479 = vst [vmem:[#allocation5 + $0x60] sm:$0xff] %v1463_v17  ;;  %v1229_v9 = vadd.f32 %v1653_v39, %v2570_v54 }
 0x1f1   :  { %v1655_v3 = vpop.f32.mrf.mxu1  ;;  %v1735_v48 = vpop.f32.mrf.mxu0 }
 0x1f2   :  { %v1464_v25 = vadd.f32 %v1733_v19, %v1229_v9  ;;  %v1656_v1 = vadd.f32 %v1655_v3, %v1654_v59  ;;  %v1736_v23 = vadd.f32 %v1735_v48, %v1734_v21 }
 0x1f3   :  { %v1657_v62 = vpop.f32.mrf.mxu1  ;;  %v1737_v60 = vpop.f32.mrf.mxu0 }
 0x1f4   :  { %1480 = vst [vmem:[#allocation5 + $0x68] sm:$0xff] %v1464_v25  ;;  %v1234_v28 = vadd.f32 %v1656_v1, %v2572_v33 }
 0x1f5   :  { %v1658_v5 = vpop.f32.mrf.mxu1  ;;  %v1738_v36 = vpop.f32.mrf.mxu0 }
 0x1f6   :  { %v1465_v22 = vadd.f32 %v1736_v23, %v1234_v28  ;;  %v1659_v29 = vadd.f32 %v1658_v5, %v1657_v62  ;;  %v1739_v14 = vadd.f32 %v1738_v36, %v1737_v60 }
 0x1f8   :  { %1481 = vst [vmem:[#allocation5 + $0x70] sm:$0xff] %v1465_v22  ;;  %v1239_v54 = vadd.f32 %v1659_v29, %v2576_v42 }
 0x1fa   :  { %v1466_v11 = vadd.f32 %v1739_v14, %v1239_v54 }
 0x1fc   :  { %1482 = vst [vmem:[#allocation5 + $0x78] sm:$0xff] %v1466_v11 }
 0x1fd   :  { %1818 = shalt.err (!%p1815_p9)
}
 0x1fe   :  { %1494 = dma.vmem_to_hbm [thread:$0]  %s1489_s1, 2048, %s2606_s4, [#allocation4], %s1832_s18, %s1832_s18, %s1833_s19  }
 0x1ff   :  { %1829 = dma.done.wait [#allocation4], 2048  }
 0x200   :  { %1830 = vsyncadd [#allocation4], 4294965248 }
 0x201   :  { %1498 = vsyncpa [#allocation3], 1 }
 0x202   :  { %1499 = vsyncpa [#allocation4], 1 }

</bundles_post_ra>
